<compile_context>
chip_gen: v5e
topology: v5e:2x2
jax: 0.10.0
libtpu: 0.0.40
codegen_flags: <defaults>
</compile_context>

<pallas_src>
import jax
import jax.numpy as jnp
from jax import lax
from jax.experimental import pallas as pl
from jax.experimental.pallas import tpu as pltpu


# ----------------------------------------------------------------------------
# Fused kernel: embedded sequence -> 3-layer LSTM recurrence -> FC
# ----------------------------------------------------------------------------
def _fused_lstm_fc_kernel(emb_ref, wih_ref, whh_ref, b_ref,
                          fcw_ref, fcb_ref, out_ref):
    TB, H = emb_ref.shape          # (T*B, H), time-major rows (row = t*B + b)
    L = wih_ref.shape[0]
    H4 = 4 * H
    B = out_ref.shape[0]
    T = TB // B

    # Lane mask selecting the "g" gate lanes (tanh); other gates use sigmoid.
    # Built once, outside the recurrence.
    lane = lax.broadcasted_iota(jnp.int32, (B, H4), 1)
    g_mask = (lane >= 2 * H) & (lane < 3 * H)

    # Hoist loop-invariant bias broadcasts out of the recurrence
    # (JAX does not CSE broadcast_in_dim).
    biases = [jnp.broadcast_to(b_ref[l], (B, H4)) for l in range(L)]

    # Layer-0 input projection for ALL timesteps: one large MXU matmul,
    # hoisted out of the sequential time loop.
    x0_all = jnp.dot(emb_ref[...], wih_ref[0],
                     preferred_element_type=jnp.float32)       # (T*B, 4H)

    hs = [jnp.zeros((B, H), jnp.float32) for _ in range(L)]
    cs = [jnp.zeros((B, H), jnp.float32) for _ in range(L)]

    for t in range(T):                          # static, fully unrolled
        for l in range(L):                      # static, unrolled
            if l == 0:
                xw = x0_all[t * B:(t + 1) * B]                  # static slice
            else:
                xw = jnp.dot(hs[l - 1], wih_ref[l],
                             preferred_element_type=jnp.float32)
            gates = (xw
                     + jnp.dot(hs[l], whh_ref[l],
                               preferred_element_type=jnp.float32)
                     + biases[l])                               # (B, 4H)
            # Whole-vreg activations on the EUP; select tanh for the g gate.
            sig = pl.reciprocal(1.0 + jnp.exp(-gates), approx=True)
            act = jnp.where(g_mask, jnp.tanh(gates), sig)
            i_g = act[:, 0 * H:1 * H]
            f_g = act[:, 1 * H:2 * H]
            g_g = act[:, 2 * H:3 * H]
            o_g = act[:, 3 * H:4 * H]
            c_new = f_g * cs[l] + i_g * g_g
            h_new = o_g * jnp.tanh(c_new)
            cs[l] = c_new
            hs[l] = h_new                       # feeds next layer this step

    # Fused FC; O is lane-padded to 128 so this is a dense full-lane store.
    out_ref[...] = (jnp.dot(hs[L - 1], fcw_ref[...],
                            preferred_element_type=jnp.float32)
                    + fcb_ref[...]).astype(out_ref.dtype)


def _full_spec(shape):
    return pl.BlockSpec(shape, lambda: (0,) * len(shape))


def fused_lstm_fc(emb_tbh, w_ih, w_hh, b, fc_w, fc_b):
    """emb_tbh: (T,B,H) f32; w_ih/w_hh: (L,H,4H); b: (L,1,4H);
    fc_w: (H,O); fc_b: (1,O)."""
    T, B, H = emb_tbh.shape
    O = fc_w.shape[1]
    O_pad = -(-O // 128) * 128                     # lane-dense output store
    fcw_p = jnp.zeros((H, O_pad), jnp.float32).at[:, :O].set(fc_w)
    fcb_p = jnp.zeros((1, O_pad), jnp.float32).at[:, :O].set(fc_b)
    emb2d = emb_tbh.reshape(T * B, H)              # time-major: row = t*B + b

    out = pl.pallas_call(
        _fused_lstm_fc_kernel,
        out_shape=jax.ShapeDtypeStruct((B, O_pad), jnp.float32),
        in_specs=[
            _full_spec(emb2d.shape),
            _full_spec(w_ih.shape),
            _full_spec(w_hh.shape),
            _full_spec(b.shape),
            _full_spec(fcw_p.shape),
            _full_spec(fcb_p.shape),
        ],
        out_specs=_full_spec((B, O_pad)),
        compiler_params=pltpu.CompilerParams(
            # Tiny working set; well under v7x's 64 MiB physical VMEM.
            vmem_limit_bytes=32 * 1024 * 1024),
    )(emb2d, w_ih, w_hh, b, fcw_p, fcb_p)
    return out[:, :O]


# ----------------------------------------------------------------------------
# Params (weights generated here; if importing real PyTorch weights remember
# PyTorch stores weight_ih/hh as (4H, in) -> transpose to (in, 4H) first).
# ----------------------------------------------------------------------------
def init_params(key, vocab_size, hidden_size, output_size, num_layers=3):
    k = 1.0 / jnp.sqrt(hidden_size)
    keys = jax.random.split(key, 2 + num_layers * 4)
    params = {}
    params["embedding"] = jax.random.normal(
        keys[0], (vocab_size, hidden_size), jnp.float32)
    wih, whh, bs = [], [], []
    for l in range(num_layers):
        kw = keys[2 + l * 4: 2 + (l + 1) * 4]
        w_ih = jax.random.uniform(kw[0], (hidden_size, 4 * hidden_size),
                                  jnp.float32, -k, k)
        w_hh = jax.random.uniform(kw[1], (hidden_size, 4 * hidden_size),
                                  jnp.float32, -k, k)
        b_ih = jax.random.uniform(kw[2], (1, 4 * hidden_size),
                                  jnp.float32, -k, k)
        b_hh = jax.random.uniform(kw[3], (1, 4 * hidden_size),
                                  jnp.float32, -k, k)
        wih.append(w_ih)
        whh.append(w_hh)
        bs.append(b_ih + b_hh)                      # biases pre-summed
    params["w_ih"] = jnp.stack(wih)                 # (L, H, 4H)
    params["w_hh"] = jnp.stack(whh)                 # (L, H, 4H)
    params["b"] = jnp.stack(bs)                     # (L, 1, 4H)
    params["fc_w"] = jax.random.uniform(keys[1], (hidden_size, output_size),
                                        jnp.float32, -k, k)
    params["fc_b"] = jnp.zeros((1, output_size), jnp.float32)
    return params


@jax.jit
def lstm_model_forward(params, tokens):
    # tokens: (B, T) int32.  Embedding lookup (gather) kept in JAX glue.
    emb = jnp.take(params["embedding"], tokens, axis=0)    # (B, T, H)
    x = jnp.transpose(emb, (1, 0, 2))                      # (T, B, H) time-major
    # TODO(synk): inter-layer dropout (p=0.3) omitted — inference semantics.
    return fused_lstm_fc(x, params["w_ih"], params["w_hh"], params["b"],
                         params["fc_w"], params["fc_b"])   # (B, O)


if __name__ == "__main__":
    vocab_size = 16     # num_embeddings (== input_size)
    hidden_size = 32
    output_size = 10
    batch = 2
    seq_len = 8

    key = jax.random.PRNGKey(0)
    pkey, xkey = jax.random.split(key)
    params = init_params(pkey, vocab_size, hidden_size, output_size)
    tokens = jax.random.randint(xkey, (batch, seq_len), 0, vocab_size,
                                dtype=jnp.int32)

    out = lstm_model_forward(params, tokens)
    jax.block_until_ready(out)
    assert out.shape == (batch, output_size)
    assert bool(jnp.all(jnp.isfinite(out)))
    print("KERNEL_OK")
</pallas_src>

<mosaic_0001>
module attributes {stable_mosaic.version = 11 : i64} {
  func.func @_fused_lstm_fc_kernel(%arg0: memref<16x32xf32, #tpu.memory_space<vmem>>, %arg1: memref<3x32x128xf32, #tpu.memory_space<vmem>>, %arg2: memref<3x32x128xf32, #tpu.memory_space<vmem>>, %arg3: memref<3x1x128xf32, #tpu.memory_space<vmem>>, %arg4: memref<32x128xf32, #tpu.memory_space<vmem>>, %arg5: memref<1x128xf32, #tpu.memory_space<vmem>>, %arg6: memref<2x128xf32, #tpu.memory_space<vmem>>) attributes {dimension_semantics = [], scalar_prefetch = 0 : i64, scratch_operands = 0 : i64, tpu.core_type = #tpu.core_type<tc>} {
    %0 = tpu.iota {dimensions = array<i32: 1>} : vector<2x128xi32>
    %c64_i32 = arith.constant 64 : i32
    %1 = vector.broadcast %c64_i32 : i32 to vector<2x128xi32>
    %2 = arith.cmpi sge, %0, %1 : vector<2x128xi32>
    %c96_i32 = arith.constant 96 : i32
    %3 = vector.broadcast %c96_i32 : i32 to vector<2x128xi32>
    %4 = arith.cmpi slt, %0, %3 : vector<2x128xi32>
    %5 = arith.andi %2, %4 : vector<2x128xi1>
    %c0 = arith.constant 0 : index
    %c0_0 = arith.constant 0 : index
    %c0_1 = arith.constant 0 : index
    %6 = vector.load %arg3[%c0, %c0_0, %c0_1] : memref<3x1x128xf32, #tpu.memory_space<vmem>>, vector<1x1x128xf32>
    %7 = vector.shape_cast %6 : vector<1x1x128xf32> to vector<1x128xf32>
    %8 = vector.shape_cast %7 : vector<1x128xf32> to vector<1x128xf32>
    %9 = vector.broadcast %8 : vector<1x128xf32> to vector<2x128xf32>
    %c1 = arith.constant 1 : index
    %c0_2 = arith.constant 0 : index
    %c0_3 = arith.constant 0 : index
    %10 = vector.load %arg3[%c1, %c0_2, %c0_3] : memref<3x1x128xf32, #tpu.memory_space<vmem>>, vector<1x1x128xf32>
    %11 = vector.shape_cast %10 : vector<1x1x128xf32> to vector<1x128xf32>
    %12 = vector.shape_cast %11 : vector<1x128xf32> to vector<1x128xf32>
    %13 = vector.broadcast %12 : vector<1x128xf32> to vector<2x128xf32>
    %c2 = arith.constant 2 : index
    %c0_4 = arith.constant 0 : index
    %c0_5 = arith.constant 0 : index
    %14 = vector.load %arg3[%c2, %c0_4, %c0_5] : memref<3x1x128xf32, #tpu.memory_space<vmem>>, vector<1x1x128xf32>
    %15 = vector.shape_cast %14 : vector<1x1x128xf32> to vector<1x128xf32>
    %16 = vector.shape_cast %15 : vector<1x128xf32> to vector<1x128xf32>
    %17 = vector.broadcast %16 : vector<1x128xf32> to vector<2x128xf32>
    %c0_6 = arith.constant 0 : index
    %c0_7 = arith.constant 0 : index
    %18 = vector.load %arg0[%c0_6, %c0_7] : memref<16x32xf32, #tpu.memory_space<vmem>>, vector<16x32xf32>
    %c0_8 = arith.constant 0 : index
    %c0_9 = arith.constant 0 : index
    %c0_10 = arith.constant 0 : index
    %19 = vector.load %arg1[%c0_8, %c0_9, %c0_10] : memref<3x32x128xf32, #tpu.memory_space<vmem>>, vector<1x32x128xf32>
    %20 = vector.shape_cast %19 : vector<1x32x128xf32> to vector<32x128xf32>
    %cst = arith.constant dense<0.000000e+00> : vector<16x128xf32>
    %21 = tpu.matmul %18, %20, %cst {dimension_numbers = #tpu.dot_dimension_numbers<[1], [0], [0], [1], [0, 0, 1, 1], [], []>} : vector<16x32xf32>, vector<32x128xf32>, vector<16x128xf32> -> vector<16x128xf32>
    %cst_11 = arith.constant 0.000000e+00 : f32
    %22 = vector.broadcast %cst_11 : f32 to vector<2x32xf32>
    %cst_12 = arith.constant 0.000000e+00 : f32
    %23 = vector.broadcast %cst_12 : f32 to vector<2x32xf32>
    %cst_13 = arith.constant 0.000000e+00 : f32
    %24 = vector.broadcast %cst_13 : f32 to vector<2x32xf32>
    %cst_14 = arith.constant 0.000000e+00 : f32
    %25 = vector.broadcast %cst_14 : f32 to vector<2x32xf32>
    %cst_15 = arith.constant 0.000000e+00 : f32
    %26 = vector.broadcast %cst_15 : f32 to vector<2x32xf32>
    %cst_16 = arith.constant 0.000000e+00 : f32
    %27 = vector.broadcast %cst_16 : f32 to vector<2x32xf32>
    %28 = vector.extract_strided_slice %21 {offsets = [0, 0], sizes = [2, 128], strides = [1, 1]} : vector<16x128xf32> to vector<2x128xf32>
    %c0_17 = arith.constant 0 : index
    %c0_18 = arith.constant 0 : index
    %c0_19 = arith.constant 0 : index
    %29 = vector.load %arg2[%c0_17, %c0_18, %c0_19] : memref<3x32x128xf32, #tpu.memory_space<vmem>>, vector<1x32x128xf32>
    %30 = vector.shape_cast %29 : vector<1x32x128xf32> to vector<32x128xf32>
    %cst_20 = arith.constant dense<0.000000e+00> : vector<2x128xf32>
    %31 = tpu.matmul %22, %30, %cst_20 {dimension_numbers = #tpu.dot_dimension_numbers<[1], [0], [0], [1], [0, 0, 1, 1], [], []>} : vector<2x32xf32>, vector<32x128xf32>, vector<2x128xf32> -> vector<2x128xf32>
    %32 = arith.addf %28, %31 : vector<2x128xf32>
    %33 = arith.addf %32, %9 : vector<2x128xf32>
    %cst_21 = arith.constant 0.000000e+00 : f32
    %34 = vector.broadcast %cst_21 : f32 to vector<2x128xf32>
    %35 = arith.subf %34, %33 : vector<2x128xf32>
    %36 = math.exp %35 : vector<2x128xf32>
    %cst_22 = arith.constant 1.000000e+00 : f32
    %37 = vector.broadcast %cst_22 : f32 to vector<2x128xf32>
    %38 = arith.addf %37, %36 : vector<2x128xf32>
    %39 = tpu.reciprocal %38 {approx = true} : vector<2x128xf32> -> vector<2x128xf32>
    %40 = math.tanh %33 : vector<2x128xf32>
    %41 = arith.select %5, %40, %39 : vector<2x128xi1>, vector<2x128xf32>
    %42 = vector.extract_strided_slice %41 {offsets = [0, 0], sizes = [2, 32], strides = [1, 1]} : vector<2x128xf32> to vector<2x32xf32>
    %43 = vector.extract_strided_slice %41 {offsets = [0, 32], sizes = [2, 32], strides = [1, 1]} : vector<2x128xf32> to vector<2x32xf32>
    %44 = vector.extract_strided_slice %41 {offsets = [0, 64], sizes = [2, 32], strides = [1, 1]} : vector<2x128xf32> to vector<2x32xf32>
    %45 = vector.extract_strided_slice %41 {offsets = [0, 96], sizes = [2, 32], strides = [1, 1]} : vector<2x128xf32> to vector<2x32xf32>
    %46 = arith.mulf %43, %25 : vector<2x32xf32>
    %47 = arith.mulf %42, %44 : vector<2x32xf32>
    %48 = arith.addf %46, %47 : vector<2x32xf32>
    %49 = math.tanh %48 : vector<2x32xf32>
    %50 = arith.mulf %45, %49 : vector<2x32xf32>
    %c1_23 = arith.constant 1 : index
    %c0_24 = arith.constant 0 : index
    %c0_25 = arith.constant 0 : index
    %51 = vector.load %arg1[%c1_23, %c0_24, %c0_25] : memref<3x32x128xf32, #tpu.memory_space<vmem>>, vector<1x32x128xf32>
    %52 = vector.shape_cast %51 : vector<1x32x128xf32> to vector<32x128xf32>
    %cst_26 = arith.constant dense<0.000000e+00> : vector<2x128xf32>
    %53 = tpu.matmul %50, %52, %cst_26 {dimension_numbers = #tpu.dot_dimension_numbers<[1], [0], [0], [1], [0, 0, 1, 1], [], []>} : vector<2x32xf32>, vector<32x128xf32>, vector<2x128xf32> -> vector<2x128xf32>
    %c1_27 = arith.constant 1 : index
    %c0_28 = arith.constant 0 : index
    %c0_29 = arith.constant 0 : index
    %54 = vector.load %arg2[%c1_27, %c0_28, %c0_29] : memref<3x32x128xf32, #tpu.memory_space<vmem>>, vector<1x32x128xf32>
    %55 = vector.shape_cast %54 : vector<1x32x128xf32> to vector<32x128xf32>
    %cst_30 = arith.constant dense<0.000000e+00> : vector<2x128xf32>
    %56 = tpu.matmul %23, %55, %cst_30 {dimension_numbers = #tpu.dot_dimension_numbers<[1], [0], [0], [1], [0, 0, 1, 1], [], []>} : vector<2x32xf32>, vector<32x128xf32>, vector<2x128xf32> -> vector<2x128xf32>
    %57 = arith.addf %53, %56 : vector<2x128xf32>
    %58 = arith.addf %57, %13 : vector<2x128xf32>
    %cst_31 = arith.constant 0.000000e+00 : f32
    %59 = vector.broadcast %cst_31 : f32 to vector<2x128xf32>
    %60 = arith.subf %59, %58 : vector<2x128xf32>
    %61 = math.exp %60 : vector<2x128xf32>
    %cst_32 = arith.constant 1.000000e+00 : f32
    %62 = vector.broadcast %cst_32 : f32 to vector<2x128xf32>
    %63 = arith.addf %62, %61 : vector<2x128xf32>
    %64 = tpu.reciprocal %63 {approx = true} : vector<2x128xf32> -> vector<2x128xf32>
    %65 = math.tanh %58 : vector<2x128xf32>
    %66 = arith.select %5, %65, %64 : vector<2x128xi1>, vector<2x128xf32>
    %67 = vector.extract_strided_slice %66 {offsets = [0, 0], sizes = [2, 32], strides = [1, 1]} : vector<2x128xf32> to vector<2x32xf32>
    %68 = vector.extract_strided_slice %66 {offsets = [0, 32], sizes = [2, 32], strides = [1, 1]} : vector<2x128xf32> to vector<2x32xf32>
    %69 = vector.extract_strided_slice %66 {offsets = [0, 64], sizes = [2, 32], strides = [1, 1]} : vector<2x128xf32> to vector<2x32xf32>
    %70 = vector.extract_strided_slice %66 {offsets = [0, 96], sizes = [2, 32], strides = [1, 1]} : vector<2x128xf32> to vector<2x32xf32>
    %71 = arith.mulf %68, %26 : vector<2x32xf32>
    %72 = arith.mulf %67, %69 : vector<2x32xf32>
    %73 = arith.addf %71, %72 : vector<2x32xf32>
    %74 = math.tanh %73 : vector<2x32xf32>
    %75 = arith.mulf %70, %74 : vector<2x32xf32>
    %c2_33 = arith.constant 2 : index
    %c0_34 = arith.constant 0 : index
    %c0_35 = arith.constant 0 : index
    %76 = vector.load %arg1[%c2_33, %c0_34, %c0_35] : memref<3x32x128xf32, #tpu.memory_space<vmem>>, vector<1x32x128xf32>
    %77 = vector.shape_cast %76 : vector<1x32x128xf32> to vector<32x128xf32>
    %cst_36 = arith.constant dense<0.000000e+00> : vector<2x128xf32>
    %78 = tpu.matmul %75, %77, %cst_36 {dimension_numbers = #tpu.dot_dimension_numbers<[1], [0], [0], [1], [0, 0, 1, 1], [], []>} : vector<2x32xf32>, vector<32x128xf32>, vector<2x128xf32> -> vector<2x128xf32>
    %c2_37 = arith.constant 2 : index
    %c0_38 = arith.constant 0 : index
    %c0_39 = arith.constant 0 : index
    %79 = vector.load %arg2[%c2_37, %c0_38, %c0_39] : memref<3x32x128xf32, #tpu.memory_space<vmem>>, vector<1x32x128xf32>
    %80 = vector.shape_cast %79 : vector<1x32x128xf32> to vector<32x128xf32>
    %cst_40 = arith.constant dense<0.000000e+00> : vector<2x128xf32>
    %81 = tpu.matmul %24, %80, %cst_40 {dimension_numbers = #tpu.dot_dimension_numbers<[1], [0], [0], [1], [0, 0, 1, 1], [], []>} : vector<2x32xf32>, vector<32x128xf32>, vector<2x128xf32> -> vector<2x128xf32>
    %82 = arith.addf %78, %81 : vector<2x128xf32>
    %83 = arith.addf %82, %17 : vector<2x128xf32>
    %cst_41 = arith.constant 0.000000e+00 : f32
    %84 = vector.broadcast %cst_41 : f32 to vector<2x128xf32>
    %85 = arith.subf %84, %83 : vector<2x128xf32>
    %86 = math.exp %85 : vector<2x128xf32>
    %cst_42 = arith.constant 1.000000e+00 : f32
    %87 = vector.broadcast %cst_42 : f32 to vector<2x128xf32>
    %88 = arith.addf %87, %86 : vector<2x128xf32>
    %89 = tpu.reciprocal %88 {approx = true} : vector<2x128xf32> -> vector<2x128xf32>
    %90 = math.tanh %83 : vector<2x128xf32>
    %91 = arith.select %5, %90, %89 : vector<2x128xi1>, vector<2x128xf32>
    %92 = vector.extract_strided_slice %91 {offsets = [0, 0], sizes = [2, 32], strides = [1, 1]} : vector<2x128xf32> to vector<2x32xf32>
    %93 = vector.extract_strided_slice %91 {offsets = [0, 32], sizes = [2, 32], strides = [1, 1]} : vector<2x128xf32> to vector<2x32xf32>
    %94 = vector.extract_strided_slice %91 {offsets = [0, 64], sizes = [2, 32], strides = [1, 1]} : vector<2x128xf32> to vector<2x32xf32>
    %95 = vector.extract_strided_slice %91 {offsets = [0, 96], sizes = [2, 32], strides = [1, 1]} : vector<2x128xf32> to vector<2x32xf32>
    %96 = arith.mulf %93, %27 : vector<2x32xf32>
    %97 = arith.mulf %92, %94 : vector<2x32xf32>
    %98 = arith.addf %96, %97 : vector<2x32xf32>
    %99 = math.tanh %98 : vector<2x32xf32>
    %100 = arith.mulf %95, %99 : vector<2x32xf32>
    %101 = vector.extract_strided_slice %21 {offsets = [2, 0], sizes = [2, 128], strides = [1, 1]} : vector<16x128xf32> to vector<2x128xf32>
    %c0_43 = arith.constant 0 : index
    %c0_44 = arith.constant 0 : index
    %c0_45 = arith.constant 0 : index
    %102 = vector.load %arg2[%c0_43, %c0_44, %c0_45] : memref<3x32x128xf32, #tpu.memory_space<vmem>>, vector<1x32x128xf32>
    %103 = vector.shape_cast %102 : vector<1x32x128xf32> to vector<32x128xf32>
    %cst_46 = arith.constant dense<0.000000e+00> : vector<2x128xf32>
    %104 = tpu.matmul %50, %103, %cst_46 {dimension_numbers = #tpu.dot_dimension_numbers<[1], [0], [0], [1], [0, 0, 1, 1], [], []>} : vector<2x32xf32>, vector<32x128xf32>, vector<2x128xf32> -> vector<2x128xf32>
    %105 = arith.addf %101, %104 : vector<2x128xf32>
    %106 = arith.addf %105, %9 : vector<2x128xf32>
    %cst_47 = arith.constant 0.000000e+00 : f32
    %107 = vector.broadcast %cst_47 : f32 to vector<2x128xf32>
    %108 = arith.subf %107, %106 : vector<2x128xf32>
    %109 = math.exp %108 : vector<2x128xf32>
    %cst_48 = arith.constant 1.000000e+00 : f32
    %110 = vector.broadcast %cst_48 : f32 to vector<2x128xf32>
    %111 = arith.addf %110, %109 : vector<2x128xf32>
    %112 = tpu.reciprocal %111 {approx = true} : vector<2x128xf32> -> vector<2x128xf32>
    %113 = math.tanh %106 : vector<2x128xf32>
    %114 = arith.select %5, %113, %112 : vector<2x128xi1>, vector<2x128xf32>
    %115 = vector.extract_strided_slice %114 {offsets = [0, 0], sizes = [2, 32], strides = [1, 1]} : vector<2x128xf32> to vector<2x32xf32>
    %116 = vector.extract_strided_slice %114 {offsets = [0, 32], sizes = [2, 32], strides = [1, 1]} : vector<2x128xf32> to vector<2x32xf32>
    %117 = vector.extract_strided_slice %114 {offsets = [0, 64], sizes = [2, 32], strides = [1, 1]} : vector<2x128xf32> to vector<2x32xf32>
    %118 = vector.extract_strided_slice %114 {offsets = [0, 96], sizes = [2, 32], strides = [1, 1]} : vector<2x128xf32> to vector<2x32xf32>
    %119 = arith.mulf %116, %48 : vector<2x32xf32>
    %120 = arith.mulf %115, %117 : vector<2x32xf32>
    %121 = arith.addf %119, %120 : vector<2x32xf32>
    %122 = math.tanh %121 : vector<2x32xf32>
    %123 = arith.mulf %118, %122 : vector<2x32xf32>
    %c1_49 = arith.constant 1 : index
    %c0_50 = arith.constant 0 : index
    %c0_51 = arith.constant 0 : index
    %124 = vector.load %arg1[%c1_49, %c0_50, %c0_51] : memref<3x32x128xf32, #tpu.memory_space<vmem>>, vector<1x32x128xf32>
    %125 = vector.shape_cast %124 : vector<1x32x128xf32> to vector<32x128xf32>
    %cst_52 = arith.constant dense<0.000000e+00> : vector<2x128xf32>
    %126 = tpu.matmul %123, %125, %cst_52 {dimension_numbers = #tpu.dot_dimension_numbers<[1], [0], [0], [1], [0, 0, 1, 1], [], []>} : vector<2x32xf32>, vector<32x128xf32>, vector<2x128xf32> -> vector<2x128xf32>
    %c1_53 = arith.constant 1 : index
    %c0_54 = arith.constant 0 : index
    %c0_55 = arith.constant 0 : index
    %127 = vector.load %arg2[%c1_53, %c0_54, %c0_55] : memref<3x32x128xf32, #tpu.memory_space<vmem>>, vector<1x32x128xf32>
    %128 = vector.shape_cast %127 : vector<1x32x128xf32> to vector<32x128xf32>
    %cst_56 = arith.constant dense<0.000000e+00> : vector<2x128xf32>
    %129 = tpu.matmul %75, %128, %cst_56 {dimension_numbers = #tpu.dot_dimension_numbers<[1], [0], [0], [1], [0, 0, 1, 1], [], []>} : vector<2x32xf32>, vector<32x128xf32>, vector<2x128xf32> -> vector<2x128xf32>
    %130 = arith.addf %126, %129 : vector<2x128xf32>
    %131 = arith.addf %130, %13 : vector<2x128xf32>
    %cst_57 = arith.constant 0.000000e+00 : f32
    %132 = vector.broadcast %cst_57 : f32 to vector<2x128xf32>
    %133 = arith.subf %132, %131 : vector<2x128xf32>
    %134 = math.exp %133 : vector<2x128xf32>
    %cst_58 = arith.constant 1.000000e+00 : f32
    %135 = vector.broadcast %cst_58 : f32 to vector<2x128xf32>
    %136 = arith.addf %135, %134 : vector<2x128xf32>
    %137 = tpu.reciprocal %136 {approx = true} : vector<2x128xf32> -> vector<2x128xf32>
    %138 = math.tanh %131 : vector<2x128xf32>
    %139 = arith.select %5, %138, %137 : vector<2x128xi1>, vector<2x128xf32>
    %140 = vector.extract_strided_slice %139 {offsets = [0, 0], sizes = [2, 32], strides = [1, 1]} : vector<2x128xf32> to vector<2x32xf32>
    %141 = vector.extract_strided_slice %139 {offsets = [0, 32], sizes = [2, 32], strides = [1, 1]} : vector<2x128xf32> to vector<2x32xf32>
    %142 = vector.extract_strided_slice %139 {offsets = [0, 64], sizes = [2, 32], strides = [1, 1]} : vector<2x128xf32> to vector<2x32xf32>
    %143 = vector.extract_strided_slice %139 {offsets = [0, 96], sizes = [2, 32], strides = [1, 1]} : vector<2x128xf32> to vector<2x32xf32>
    %144 = arith.mulf %141, %73 : vector<2x32xf32>
    %145 = arith.mulf %140, %142 : vector<2x32xf32>
    %146 = arith.addf %144, %145 : vector<2x32xf32>
    %147 = math.tanh %146 : vector<2x32xf32>
    %148 = arith.mulf %143, %147 : vector<2x32xf32>
    %c2_59 = arith.constant 2 : index
    %c0_60 = arith.constant 0 : index
    %c0_61 = arith.constant 0 : index
    %149 = vector.load %arg1[%c2_59, %c0_60, %c0_61] : memref<3x32x128xf32, #tpu.memory_space<vmem>>, vector<1x32x128xf32>
    %150 = vector.shape_cast %149 : vector<1x32x128xf32> to vector<32x128xf32>
    %cst_62 = arith.constant dense<0.000000e+00> : vector<2x128xf32>
    %151 = tpu.matmul %148, %150, %cst_62 {dimension_numbers = #tpu.dot_dimension_numbers<[1], [0], [0], [1], [0, 0, 1, 1], [], []>} : vector<2x32xf32>, vector<32x128xf32>, vector<2x128xf32> -> vector<2x128xf32>
    %c2_63 = arith.constant 2 : index
    %c0_64 = arith.constant 0 : index
    %c0_65 = arith.constant 0 : index
    %152 = vector.load %arg2[%c2_63, %c0_64, %c0_65] : memref<3x32x128xf32, #tpu.memory_space<vmem>>, vector<1x32x128xf32>
    %153 = vector.shape_cast %152 : vector<1x32x128xf32> to vector<32x128xf32>
    %cst_66 = arith.constant dense<0.000000e+00> : vector<2x128xf32>
    %154 = tpu.matmul %100, %153, %cst_66 {dimension_numbers = #tpu.dot_dimension_numbers<[1], [0], [0], [1], [0, 0, 1, 1], [], []>} : vector<2x32xf32>, vector<32x128xf32>, vector<2x128xf32> -> vector<2x128xf32>
    %155 = arith.addf %151, %154 : vector<2x128xf32>
    %156 = arith.addf %155, %17 : vector<2x128xf32>
    %cst_67 = arith.constant 0.000000e+00 : f32
    %157 = vector.broadcast %cst_67 : f32 to vector<2x128xf32>
    %158 = arith.subf %157, %156 : vector<2x128xf32>
    %159 = math.exp %158 : vector<2x128xf32>
    %cst_68 = arith.constant 1.000000e+00 : f32
    %160 = vector.broadcast %cst_68 : f32 to vector<2x128xf32>
    %161 = arith.addf %160, %159 : vector<2x128xf32>
    %162 = tpu.reciprocal %161 {approx = true} : vector<2x128xf32> -> vector<2x128xf32>
    %163 = math.tanh %156 : vector<2x128xf32>
    %164 = arith.select %5, %163, %162 : vector<2x128xi1>, vector<2x128xf32>
    %165 = vector.extract_strided_slice %164 {offsets = [0, 0], sizes = [2, 32], strides = [1, 1]} : vector<2x128xf32> to vector<2x32xf32>
    %166 = vector.extract_strided_slice %164 {offsets = [0, 32], sizes = [2, 32], strides = [1, 1]} : vector<2x128xf32> to vector<2x32xf32>
    %167 = vector.extract_strided_slice %164 {offsets = [0, 64], sizes = [2, 32], strides = [1, 1]} : vector<2x128xf32> to vector<2x32xf32>
    %168 = vector.extract_strided_slice %164 {offsets = [0, 96], sizes = [2, 32], strides = [1, 1]} : vector<2x128xf32> to vector<2x32xf32>
    %169 = arith.mulf %166, %98 : vector<2x32xf32>
    %170 = arith.mulf %165, %167 : vector<2x32xf32>
    %171 = arith.addf %169, %170 : vector<2x32xf32>
    %172 = math.tanh %171 : vector<2x32xf32>
    %173 = arith.mulf %168, %172 : vector<2x32xf32>
    %174 = vector.extract_strided_slice %21 {offsets = [4, 0], sizes = [2, 128], strides = [1, 1]} : vector<16x128xf32> to vector<2x128xf32>
    %c0_69 = arith.constant 0 : index
    %c0_70 = arith.constant 0 : index
    %c0_71 = arith.constant 0 : index
    %175 = vector.load %arg2[%c0_69, %c0_70, %c0_71] : memref<3x32x128xf32, #tpu.memory_space<vmem>>, vector<1x32x128xf32>
    %176 = vector.shape_cast %175 : vector<1x32x128xf32> to vector<32x128xf32>
    %cst_72 = arith.constant dense<0.000000e+00> : vector<2x128xf32>
    %177 = tpu.matmul %123, %176, %cst_72 {dimension_numbers = #tpu.dot_dimension_numbers<[1], [0], [0], [1], [0, 0, 1, 1], [], []>} : vector<2x32xf32>, vector<32x128xf32>, vector<2x128xf32> -> vector<2x128xf32>
    %178 = arith.addf %174, %177 : vector<2x128xf32>
    %179 = arith.addf %178, %9 : vector<2x128xf32>
    %cst_73 = arith.constant 0.000000e+00 : f32
    %180 = vector.broadcast %cst_73 : f32 to vector<2x128xf32>
    %181 = arith.subf %180, %179 : vector<2x128xf32>
    %182 = math.exp %181 : vector<2x128xf32>
    %cst_74 = arith.constant 1.000000e+00 : f32
    %183 = vector.broadcast %cst_74 : f32 to vector<2x128xf32>
    %184 = arith.addf %183, %182 : vector<2x128xf32>
    %185 = tpu.reciprocal %184 {approx = true} : vector<2x128xf32> -> vector<2x128xf32>
    %186 = math.tanh %179 : vector<2x128xf32>
    %187 = arith.select %5, %186, %185 : vector<2x128xi1>, vector<2x128xf32>
    %188 = vector.extract_strided_slice %187 {offsets = [0, 0], sizes = [2, 32], strides = [1, 1]} : vector<2x128xf32> to vector<2x32xf32>
    %189 = vector.extract_strided_slice %187 {offsets = [0, 32], sizes = [2, 32], strides = [1, 1]} : vector<2x128xf32> to vector<2x32xf32>
    %190 = vector.extract_strided_slice %187 {offsets = [0, 64], sizes = [2, 32], strides = [1, 1]} : vector<2x128xf32> to vector<2x32xf32>
    %191 = vector.extract_strided_slice %187 {offsets = [0, 96], sizes = [2, 32], strides = [1, 1]} : vector<2x128xf32> to vector<2x32xf32>
    %192 = arith.mulf %189, %121 : vector<2x32xf32>
    %193 = arith.mulf %188, %190 : vector<2x32xf32>
    %194 = arith.addf %192, %193 : vector<2x32xf32>
    %195 = math.tanh %194 : vector<2x32xf32>
    %196 = arith.mulf %191, %195 : vector<2x32xf32>
    %c1_75 = arith.constant 1 : index
    %c0_76 = arith.constant 0 : index
    %c0_77 = arith.constant 0 : index
    %197 = vector.load %arg1[%c1_75, %c0_76, %c0_77] : memref<3x32x128xf32, #tpu.memory_space<vmem>>, vector<1x32x128xf32>
    %198 = vector.shape_cast %197 : vector<1x32x128xf32> to vector<32x128xf32>
    %cst_78 = arith.constant dense<0.000000e+00> : vector<2x128xf32>
    %199 = tpu.matmul %196, %198, %cst_78 {dimension_numbers = #tpu.dot_dimension_numbers<[1], [0], [0], [1], [0, 0, 1, 1], [], []>} : vector<2x32xf32>, vector<32x128xf32>, vector<2x128xf32> -> vector<2x128xf32>
    %c1_79 = arith.constant 1 : index
    %c0_80 = arith.constant 0 : index
    %c0_81 = arith.constant 0 : index
    %200 = vector.load %arg2[%c1_79, %c0_80, %c0_81] : memref<3x32x128xf32, #tpu.memory_space<vmem>>, vector<1x32x128xf32>
    %201 = vector.shape_cast %200 : vector<1x32x128xf32> to vector<32x128xf32>
    %cst_82 = arith.constant dense<0.000000e+00> : vector<2x128xf32>
    %202 = tpu.matmul %148, %201, %cst_82 {dimension_numbers = #tpu.dot_dimension_numbers<[1], [0], [0], [1], [0, 0, 1, 1], [], []>} : vector<2x32xf32>, vector<32x128xf32>, vector<2x128xf32> -> vector<2x128xf32>
    %203 = arith.addf %199, %202 : vector<2x128xf32>
    %204 = arith.addf %203, %13 : vector<2x128xf32>
    %cst_83 = arith.constant 0.000000e+00 : f32
    %205 = vector.broadcast %cst_83 : f32 to vector<2x128xf32>
    %206 = arith.subf %205, %204 : vector<2x128xf32>
    %207 = math.exp %206 : vector<2x128xf32>
    %cst_84 = arith.constant 1.000000e+00 : f32
    %208 = vector.broadcast %cst_84 : f32 to vector<2x128xf32>
    %209 = arith.addf %208, %207 : vector<2x128xf32>
    %210 = tpu.reciprocal %209 {approx = true} : vector<2x128xf32> -> vector<2x128xf32>
    %211 = math.tanh %204 : vector<2x128xf32>
    %212 = arith.select %5, %211, %210 : vector<2x128xi1>, vector<2x128xf32>
    %213 = vector.extract_strided_slice %212 {offsets = [0, 0], sizes = [2, 32], strides = [1, 1]} : vector<2x128xf32> to vector<2x32xf32>
    %214 = vector.extract_strided_slice %212 {offsets = [0, 32], sizes = [2, 32], strides = [1, 1]} : vector<2x128xf32> to vector<2x32xf32>
    %215 = vector.extract_strided_slice %212 {offsets = [0, 64], sizes = [2, 32], strides = [1, 1]} : vector<2x128xf32> to vector<2x32xf32>
    %216 = vector.extract_strided_slice %212 {offsets = [0, 96], sizes = [2, 32], strides = [1, 1]} : vector<2x128xf32> to vector<2x32xf32>
    %217 = arith.mulf %214, %146 : vector<2x32xf32>
    %218 = arith.mulf %213, %215 : vector<2x32xf32>
    %219 = arith.addf %217, %218 : vector<2x32xf32>
    %220 = math.tanh %219 : vector<2x32xf32>
    %221 = arith.mulf %216, %220 : vector<2x32xf32>
    %c2_85 = arith.constant 2 : index
    %c0_86 = arith.constant 0 : index
    %c0_87 = arith.constant 0 : index
    %222 = vector.load %arg1[%c2_85, %c0_86, %c0_87] : memref<3x32x128xf32, #tpu.memory_space<vmem>>, vector<1x32x128xf32>
    %223 = vector.shape_cast %222 : vector<1x32x128xf32> to vector<32x128xf32>
    %cst_88 = arith.constant dense<0.000000e+00> : vector<2x128xf32>
    %224 = tpu.matmul %221, %223, %cst_88 {dimension_numbers = #tpu.dot_dimension_numbers<[1], [0], [0], [1], [0, 0, 1, 1], [], []>} : vector<2x32xf32>, vector<32x128xf32>, vector<2x128xf32> -> vector<2x128xf32>
    %c2_89 = arith.constant 2 : index
    %c0_90 = arith.constant 0 : index
    %c0_91 = arith.constant 0 : index
    %225 = vector.load %arg2[%c2_89, %c0_90, %c0_91] : memref<3x32x128xf32, #tpu.memory_space<vmem>>, vector<1x32x128xf32>
    %226 = vector.shape_cast %225 : vector<1x32x128xf32> to vector<32x128xf32>
    %cst_92 = arith.constant dense<0.000000e+00> : vector<2x128xf32>
    %227 = tpu.matmul %173, %226, %cst_92 {dimension_numbers = #tpu.dot_dimension_numbers<[1], [0], [0], [1], [0, 0, 1, 1], [], []>} : vector<2x32xf32>, vector<32x128xf32>, vector<2x128xf32> -> vector<2x128xf32>
    %228 = arith.addf %224, %227 : vector<2x128xf32>
    %229 = arith.addf %228, %17 : vector<2x128xf32>
    %cst_93 = arith.constant 0.000000e+00 : f32
    %230 = vector.broadcast %cst_93 : f32 to vector<2x128xf32>
    %231 = arith.subf %230, %229 : vector<2x128xf32>
    %232 = math.exp %231 : vector<2x128xf32>
    %cst_94 = arith.constant 1.000000e+00 : f32
    %233 = vector.broadcast %cst_94 : f32 to vector<2x128xf32>
    %234 = arith.addf %233, %232 : vector<2x128xf32>
    %235 = tpu.reciprocal %234 {approx = true} : vector<2x128xf32> -> vector<2x128xf32>
    %236 = math.tanh %229 : vector<2x128xf32>
    %237 = arith.select %5, %236, %235 : vector<2x128xi1>, vector<2x128xf32>
    %238 = vector.extract_strided_slice %237 {offsets = [0, 0], sizes = [2, 32], strides = [1, 1]} : vector<2x128xf32> to vector<2x32xf32>
    %239 = vector.extract_strided_slice %237 {offsets = [0, 32], sizes = [2, 32], strides = [1, 1]} : vector<2x128xf32> to vector<2x32xf32>
    %240 = vector.extract_strided_slice %237 {offsets = [0, 64], sizes = [2, 32], strides = [1, 1]} : vector<2x128xf32> to vector<2x32xf32>
    %241 = vector.extract_strided_slice %237 {offsets = [0, 96], sizes = [2, 32], strides = [1, 1]} : vector<2x128xf32> to vector<2x32xf32>
    %242 = arith.mulf %239, %171 : vector<2x32xf32>
    %243 = arith.mulf %238, %240 : vector<2x32xf32>
    %244 = arith.addf %242, %243 : vector<2x32xf32>
    %245 = math.tanh %244 : vector<2x32xf32>
    %246 = arith.mulf %241, %245 : vector<2x32xf32>
    %247 = vector.extract_strided_slice %21 {offsets = [6, 0], sizes = [2, 128], strides = [1, 1]} : vector<16x128xf32> to vector<2x128xf32>
    %c0_95 = arith.constant 0 : index
    %c0_96 = arith.constant 0 : index
    %c0_97 = arith.constant 0 : index
    %248 = vector.load %arg2[%c0_95, %c0_96, %c0_97] : memref<3x32x128xf32, #tpu.memory_space<vmem>>, vector<1x32x128xf32>
    %249 = vector.shape_cast %248 : vector<1x32x128xf32> to vector<32x128xf32>
    %cst_98 = arith.constant dense<0.000000e+00> : vector<2x128xf32>
    %250 = tpu.matmul %196, %249, %cst_98 {dimension_numbers = #tpu.dot_dimension_numbers<[1], [0], [0], [1], [0, 0, 1, 1], [], []>} : vector<2x32xf32>, vector<32x128xf32>, vector<2x128xf32> -> vector<2x128xf32>
    %251 = arith.addf %247, %250 : vector<2x128xf32>
    %252 = arith.addf %251, %9 : vector<2x128xf32>
    %cst_99 = arith.constant 0.000000e+00 : f32
    %253 = vector.broadcast %cst_99 : f32 to vector<2x128xf32>
    %254 = arith.subf %253, %252 : vector<2x128xf32>
    %255 = math.exp %254 : vector<2x128xf32>
    %cst_100 = arith.constant 1.000000e+00 : f32
    %256 = vector.broadcast %cst_100 : f32 to vector<2x128xf32>
    %257 = arith.addf %256, %255 : vector<2x128xf32>
    %258 = tpu.reciprocal %257 {approx = true} : vector<2x128xf32> -> vector<2x128xf32>
    %259 = math.tanh %252 : vector<2x128xf32>
    %260 = arith.select %5, %259, %258 : vector<2x128xi1>, vector<2x128xf32>
    %261 = vector.extract_strided_slice %260 {offsets = [0, 0], sizes = [2, 32], strides = [1, 1]} : vector<2x128xf32> to vector<2x32xf32>
    %262 = vector.extract_strided_slice %260 {offsets = [0, 32], sizes = [2, 32], strides = [1, 1]} : vector<2x128xf32> to vector<2x32xf32>
    %263 = vector.extract_strided_slice %260 {offsets = [0, 64], sizes = [2, 32], strides = [1, 1]} : vector<2x128xf32> to vector<2x32xf32>
    %264 = vector.extract_strided_slice %260 {offsets = [0, 96], sizes = [2, 32], strides = [1, 1]} : vector<2x128xf32> to vector<2x32xf32>
    %265 = arith.mulf %262, %194 : vector<2x32xf32>
    %266 = arith.mulf %261, %263 : vector<2x32xf32>
    %267 = arith.addf %265, %266 : vector<2x32xf32>
    %268 = math.tanh %267 : vector<2x32xf32>
    %269 = arith.mulf %264, %268 : vector<2x32xf32>
    %c1_101 = arith.constant 1 : index
    %c0_102 = arith.constant 0 : index
    %c0_103 = arith.constant 0 : index
    %270 = vector.load %arg1[%c1_101, %c0_102, %c0_103] : memref<3x32x128xf32, #tpu.memory_space<vmem>>, vector<1x32x128xf32>
    %271 = vector.shape_cast %270 : vector<1x32x128xf32> to vector<32x128xf32>
    %cst_104 = arith.constant dense<0.000000e+00> : vector<2x128xf32>
    %272 = tpu.matmul %269, %271, %cst_104 {dimension_numbers = #tpu.dot_dimension_numbers<[1], [0], [0], [1], [0, 0, 1, 1], [], []>} : vector<2x32xf32>, vector<32x128xf32>, vector<2x128xf32> -> vector<2x128xf32>
    %c1_105 = arith.constant 1 : index
    %c0_106 = arith.constant 0 : index
    %c0_107 = arith.constant 0 : index
    %273 = vector.load %arg2[%c1_105, %c0_106, %c0_107] : memref<3x32x128xf32, #tpu.memory_space<vmem>>, vector<1x32x128xf32>
    %274 = vector.shape_cast %273 : vector<1x32x128xf32> to vector<32x128xf32>
    %cst_108 = arith.constant dense<0.000000e+00> : vector<2x128xf32>
    %275 = tpu.matmul %221, %274, %cst_108 {dimension_numbers = #tpu.dot_dimension_numbers<[1], [0], [0], [1], [0, 0, 1, 1], [], []>} : vector<2x32xf32>, vector<32x128xf32>, vector<2x128xf32> -> vector<2x128xf32>
    %276 = arith.addf %272, %275 : vector<2x128xf32>
    %277 = arith.addf %276, %13 : vector<2x128xf32>
    %cst_109 = arith.constant 0.000000e+00 : f32
    %278 = vector.broadcast %cst_109 : f32 to vector<2x128xf32>
    %279 = arith.subf %278, %277 : vector<2x128xf32>
    %280 = math.exp %279 : vector<2x128xf32>
    %cst_110 = arith.constant 1.000000e+00 : f32
    %281 = vector.broadcast %cst_110 : f32 to vector<2x128xf32>
    %282 = arith.addf %281, %280 : vector<2x128xf32>
    %283 = tpu.reciprocal %282 {approx = true} : vector<2x128xf32> -> vector<2x128xf32>
    %284 = math.tanh %277 : vector<2x128xf32>
    %285 = arith.select %5, %284, %283 : vector<2x128xi1>, vector<2x128xf32>
    %286 = vector.extract_strided_slice %285 {offsets = [0, 0], sizes = [2, 32], strides = [1, 1]} : vector<2x128xf32> to vector<2x32xf32>
    %287 = vector.extract_strided_slice %285 {offsets = [0, 32], sizes = [2, 32], strides = [1, 1]} : vector<2x128xf32> to vector<2x32xf32>
    %288 = vector.extract_strided_slice %285 {offsets = [0, 64], sizes = [2, 32], strides = [1, 1]} : vector<2x128xf32> to vector<2x32xf32>
    %289 = vector.extract_strided_slice %285 {offsets = [0, 96], sizes = [2, 32], strides = [1, 1]} : vector<2x128xf32> to vector<2x32xf32>
    %290 = arith.mulf %287, %219 : vector<2x32xf32>
    %291 = arith.mulf %286, %288 : vector<2x32xf32>
    %292 = arith.addf %290, %291 : vector<2x32xf32>
    %293 = math.tanh %292 : vector<2x32xf32>
    %294 = arith.mulf %289, %293 : vector<2x32xf32>
    %c2_111 = arith.constant 2 : index
    %c0_112 = arith.constant 0 : index
    %c0_113 = arith.constant 0 : index
    %295 = vector.load %arg1[%c2_111, %c0_112, %c0_113] : memref<3x32x128xf32, #tpu.memory_space<vmem>>, vector<1x32x128xf32>
    %296 = vector.shape_cast %295 : vector<1x32x128xf32> to vector<32x128xf32>
    %cst_114 = arith.constant dense<0.000000e+00> : vector<2x128xf32>
    %297 = tpu.matmul %294, %296, %cst_114 {dimension_numbers = #tpu.dot_dimension_numbers<[1], [0], [0], [1], [0, 0, 1, 1], [], []>} : vector<2x32xf32>, vector<32x128xf32>, vector<2x128xf32> -> vector<2x128xf32>
    %c2_115 = arith.constant 2 : index
    %c0_116 = arith.constant 0 : index
    %c0_117 = arith.constant 0 : index
    %298 = vector.load %arg2[%c2_115, %c0_116, %c0_117] : memref<3x32x128xf32, #tpu.memory_space<vmem>>, vector<1x32x128xf32>
    %299 = vector.shape_cast %298 : vector<1x32x128xf32> to vector<32x128xf32>
    %cst_118 = arith.constant dense<0.000000e+00> : vector<2x128xf32>
    %300 = tpu.matmul %246, %299, %cst_118 {dimension_numbers = #tpu.dot_dimension_numbers<[1], [0], [0], [1], [0, 0, 1, 1], [], []>} : vector<2x32xf32>, vector<32x128xf32>, vector<2x128xf32> -> vector<2x128xf32>
    %301 = arith.addf %297, %300 : vector<2x128xf32>
    %302 = arith.addf %301, %17 : vector<2x128xf32>
    %cst_119 = arith.constant 0.000000e+00 : f32
    %303 = vector.broadcast %cst_119 : f32 to vector<2x128xf32>
    %304 = arith.subf %303, %302 : vector<2x128xf32>
    %305 = math.exp %304 : vector<2x128xf32>
    %cst_120 = arith.constant 1.000000e+00 : f32
    %306 = vector.broadcast %cst_120 : f32 to vector<2x128xf32>
    %307 = arith.addf %306, %305 : vector<2x128xf32>
    %308 = tpu.reciprocal %307 {approx = true} : vector<2x128xf32> -> vector<2x128xf32>
    %309 = math.tanh %302 : vector<2x128xf32>
    %310 = arith.select %5, %309, %308 : vector<2x128xi1>, vector<2x128xf32>
    %311 = vector.extract_strided_slice %310 {offsets = [0, 0], sizes = [2, 32], strides = [1, 1]} : vector<2x128xf32> to vector<2x32xf32>
    %312 = vector.extract_strided_slice %310 {offsets = [0, 32], sizes = [2, 32], strides = [1, 1]} : vector<2x128xf32> to vector<2x32xf32>
    %313 = vector.extract_strided_slice %310 {offsets = [0, 64], sizes = [2, 32], strides = [1, 1]} : vector<2x128xf32> to vector<2x32xf32>
    %314 = vector.extract_strided_slice %310 {offsets = [0, 96], sizes = [2, 32], strides = [1, 1]} : vector<2x128xf32> to vector<2x32xf32>
    %315 = arith.mulf %312, %244 : vector<2x32xf32>
    %316 = arith.mulf %311, %313 : vector<2x32xf32>
    %317 = arith.addf %315, %316 : vector<2x32xf32>
    %318 = math.tanh %317 : vector<2x32xf32>
    %319 = arith.mulf %314, %318 : vector<2x32xf32>
    %320 = vector.extract_strided_slice %21 {offsets = [8, 0], sizes = [2, 128], strides = [1, 1]} : vector<16x128xf32> to vector<2x128xf32>
    %c0_121 = arith.constant 0 : index
    %c0_122 = arith.constant 0 : index
    %c0_123 = arith.constant 0 : index
    %321 = vector.load %arg2[%c0_121, %c0_122, %c0_123] : memref<3x32x128xf32, #tpu.memory_space<vmem>>, vector<1x32x128xf32>
    %322 = vector.shape_cast %321 : vector<1x32x128xf32> to vector<32x128xf32>
    %cst_124 = arith.constant dense<0.000000e+00> : vector<2x128xf32>
    %323 = tpu.matmul %269, %322, %cst_124 {dimension_numbers = #tpu.dot_dimension_numbers<[1], [0], [0], [1], [0, 0, 1, 1], [], []>} : vector<2x32xf32>, vector<32x128xf32>, vector<2x128xf32> -> vector<2x128xf32>
    %324 = arith.addf %320, %323 : vector<2x128xf32>
    %325 = arith.addf %324, %9 : vector<2x128xf32>
    %cst_125 = arith.constant 0.000000e+00 : f32
    %326 = vector.broadcast %cst_125 : f32 to vector<2x128xf32>
    %327 = arith.subf %326, %325 : vector<2x128xf32>
    %328 = math.exp %327 : vector<2x128xf32>
    %cst_126 = arith.constant 1.000000e+00 : f32
    %329 = vector.broadcast %cst_126 : f32 to vector<2x128xf32>
    %330 = arith.addf %329, %328 : vector<2x128xf32>
    %331 = tpu.reciprocal %330 {approx = true} : vector<2x128xf32> -> vector<2x128xf32>
    %332 = math.tanh %325 : vector<2x128xf32>
    %333 = arith.select %5, %332, %331 : vector<2x128xi1>, vector<2x128xf32>
    %334 = vector.extract_strided_slice %333 {offsets = [0, 0], sizes = [2, 32], strides = [1, 1]} : vector<2x128xf32> to vector<2x32xf32>
    %335 = vector.extract_strided_slice %333 {offsets = [0, 32], sizes = [2, 32], strides = [1, 1]} : vector<2x128xf32> to vector<2x32xf32>
    %336 = vector.extract_strided_slice %333 {offsets = [0, 64], sizes = [2, 32], strides = [1, 1]} : vector<2x128xf32> to vector<2x32xf32>
    %337 = vector.extract_strided_slice %333 {offsets = [0, 96], sizes = [2, 32], strides = [1, 1]} : vector<2x128xf32> to vector<2x32xf32>
    %338 = arith.mulf %335, %267 : vector<2x32xf32>
    %339 = arith.mulf %334, %336 : vector<2x32xf32>
    %340 = arith.addf %338, %339 : vector<2x32xf32>
    %341 = math.tanh %340 : vector<2x32xf32>
    %342 = arith.mulf %337, %341 : vector<2x32xf32>
    %c1_127 = arith.constant 1 : index
    %c0_128 = arith.constant 0 : index
    %c0_129 = arith.constant 0 : index
    %343 = vector.load %arg1[%c1_127, %c0_128, %c0_129] : memref<3x32x128xf32, #tpu.memory_space<vmem>>, vector<1x32x128xf32>
    %344 = vector.shape_cast %343 : vector<1x32x128xf32> to vector<32x128xf32>
    %cst_130 = arith.constant dense<0.000000e+00> : vector<2x128xf32>
    %345 = tpu.matmul %342, %344, %cst_130 {dimension_numbers = #tpu.dot_dimension_numbers<[1], [0], [0], [1], [0, 0, 1, 1], [], []>} : vector<2x32xf32>, vector<32x128xf32>, vector<2x128xf32> -> vector<2x128xf32>
    %c1_131 = arith.constant 1 : index
    %c0_132 = arith.constant 0 : index
    %c0_133 = arith.constant 0 : index
    %346 = vector.load %arg2[%c1_131, %c0_132, %c0_133] : memref<3x32x128xf32, #tpu.memory_space<vmem>>, vector<1x32x128xf32>
    %347 = vector.shape_cast %346 : vector<1x32x128xf32> to vector<32x128xf32>
    %cst_134 = arith.constant dense<0.000000e+00> : vector<2x128xf32>
    %348 = tpu.matmul %294, %347, %cst_134 {dimension_numbers = #tpu.dot_dimension_numbers<[1], [0], [0], [1], [0, 0, 1, 1], [], []>} : vector<2x32xf32>, vector<32x128xf32>, vector<2x128xf32> -> vector<2x128xf32>
    %349 = arith.addf %345, %348 : vector<2x128xf32>
    %350 = arith.addf %349, %13 : vector<2x128xf32>
    %cst_135 = arith.constant 0.000000e+00 : f32
    %351 = vector.broadcast %cst_135 : f32 to vector<2x128xf32>
    %352 = arith.subf %351, %350 : vector<2x128xf32>
    %353 = math.exp %352 : vector<2x128xf32>
    %cst_136 = arith.constant 1.000000e+00 : f32
    %354 = vector.broadcast %cst_136 : f32 to vector<2x128xf32>
    %355 = arith.addf %354, %353 : vector<2x128xf32>
    %356 = tpu.reciprocal %355 {approx = true} : vector<2x128xf32> -> vector<2x128xf32>
    %357 = math.tanh %350 : vector<2x128xf32>
    %358 = arith.select %5, %357, %356 : vector<2x128xi1>, vector<2x128xf32>
    %359 = vector.extract_strided_slice %358 {offsets = [0, 0], sizes = [2, 32], strides = [1, 1]} : vector<2x128xf32> to vector<2x32xf32>
    %360 = vector.extract_strided_slice %358 {offsets = [0, 32], sizes = [2, 32], strides = [1, 1]} : vector<2x128xf32> to vector<2x32xf32>
    %361 = vector.extract_strided_slice %358 {offsets = [0, 64], sizes = [2, 32], strides = [1, 1]} : vector<2x128xf32> to vector<2x32xf32>
    %362 = vector.extract_strided_slice %358 {offsets = [0, 96], sizes = [2, 32], strides = [1, 1]} : vector<2x128xf32> to vector<2x32xf32>
    %363 = arith.mulf %360, %292 : vector<2x32xf32>
    %364 = arith.mulf %359, %361 : vector<2x32xf32>
    %365 = arith.addf %363, %364 : vector<2x32xf32>
    %366 = math.tanh %365 : vector<2x32xf32>
    %367 = arith.mulf %362, %366 : vector<2x32xf32>
    %c2_137 = arith.constant 2 : index
    %c0_138 = arith.constant 0 : index
    %c0_139 = arith.constant 0 : index
    %368 = vector.load %arg1[%c2_137, %c0_138, %c0_139] : memref<3x32x128xf32, #tpu.memory_space<vmem>>, vector<1x32x128xf32>
    %369 = vector.shape_cast %368 : vector<1x32x128xf32> to vector<32x128xf32>
    %cst_140 = arith.constant dense<0.000000e+00> : vector<2x128xf32>
    %370 = tpu.matmul %367, %369, %cst_140 {dimension_numbers = #tpu.dot_dimension_numbers<[1], [0], [0], [1], [0, 0, 1, 1], [], []>} : vector<2x32xf32>, vector<32x128xf32>, vector<2x128xf32> -> vector<2x128xf32>
    %c2_141 = arith.constant 2 : index
    %c0_142 = arith.constant 0 : index
    %c0_143 = arith.constant 0 : index
    %371 = vector.load %arg2[%c2_141, %c0_142, %c0_143] : memref<3x32x128xf32, #tpu.memory_space<vmem>>, vector<1x32x128xf32>
    %372 = vector.shape_cast %371 : vector<1x32x128xf32> to vector<32x128xf32>
    %cst_144 = arith.constant dense<0.000000e+00> : vector<2x128xf32>
    %373 = tpu.matmul %319, %372, %cst_144 {dimension_numbers = #tpu.dot_dimension_numbers<[1], [0], [0], [1], [0, 0, 1, 1], [], []>} : vector<2x32xf32>, vector<32x128xf32>, vector<2x128xf32> -> vector<2x128xf32>
    %374 = arith.addf %370, %373 : vector<2x128xf32>
    %375 = arith.addf %374, %17 : vector<2x128xf32>
    %cst_145 = arith.constant 0.000000e+00 : f32
    %376 = vector.broadcast %cst_145 : f32 to vector<2x128xf32>
    %377 = arith.subf %376, %375 : vector<2x128xf32>
    %378 = math.exp %377 : vector<2x128xf32>
    %cst_146 = arith.constant 1.000000e+00 : f32
    %379 = vector.broadcast %cst_146 : f32 to vector<2x128xf32>
    %380 = arith.addf %379, %378 : vector<2x128xf32>
    %381 = tpu.reciprocal %380 {approx = true} : vector<2x128xf32> -> vector<2x128xf32>
    %382 = math.tanh %375 : vector<2x128xf32>
    %383 = arith.select %5, %382, %381 : vector<2x128xi1>, vector<2x128xf32>
    %384 = vector.extract_strided_slice %383 {offsets = [0, 0], sizes = [2, 32], strides = [1, 1]} : vector<2x128xf32> to vector<2x32xf32>
    %385 = vector.extract_strided_slice %383 {offsets = [0, 32], sizes = [2, 32], strides = [1, 1]} : vector<2x128xf32> to vector<2x32xf32>
    %386 = vector.extract_strided_slice %383 {offsets = [0, 64], sizes = [2, 32], strides = [1, 1]} : vector<2x128xf32> to vector<2x32xf32>
    %387 = vector.extract_strided_slice %383 {offsets = [0, 96], sizes = [2, 32], strides = [1, 1]} : vector<2x128xf32> to vector<2x32xf32>
    %388 = arith.mulf %385, %317 : vector<2x32xf32>
    %389 = arith.mulf %384, %386 : vector<2x32xf32>
    %390 = arith.addf %388, %389 : vector<2x32xf32>
    %391 = math.tanh %390 : vector<2x32xf32>
    %392 = arith.mulf %387, %391 : vector<2x32xf32>
    %393 = vector.extract_strided_slice %21 {offsets = [10, 0], sizes = [2, 128], strides = [1, 1]} : vector<16x128xf32> to vector<2x128xf32>
    %c0_147 = arith.constant 0 : index
    %c0_148 = arith.constant 0 : index
    %c0_149 = arith.constant 0 : index
    %394 = vector.load %arg2[%c0_147, %c0_148, %c0_149] : memref<3x32x128xf32, #tpu.memory_space<vmem>>, vector<1x32x128xf32>
    %395 = vector.shape_cast %394 : vector<1x32x128xf32> to vector<32x128xf32>
    %cst_150 = arith.constant dense<0.000000e+00> : vector<2x128xf32>
    %396 = tpu.matmul %342, %395, %cst_150 {dimension_numbers = #tpu.dot_dimension_numbers<[1], [0], [0], [1], [0, 0, 1, 1], [], []>} : vector<2x32xf32>, vector<32x128xf32>, vector<2x128xf32> -> vector<2x128xf32>
    %397 = arith.addf %393, %396 : vector<2x128xf32>
    %398 = arith.addf %397, %9 : vector<2x128xf32>
    %cst_151 = arith.constant 0.000000e+00 : f32
    %399 = vector.broadcast %cst_151 : f32 to vector<2x128xf32>
    %400 = arith.subf %399, %398 : vector<2x128xf32>
    %401 = math.exp %400 : vector<2x128xf32>
    %cst_152 = arith.constant 1.000000e+00 : f32
    %402 = vector.broadcast %cst_152 : f32 to vector<2x128xf32>
    %403 = arith.addf %402, %401 : vector<2x128xf32>
    %404 = tpu.reciprocal %403 {approx = true} : vector<2x128xf32> -> vector<2x128xf32>
    %405 = math.tanh %398 : vector<2x128xf32>
    %406 = arith.select %5, %405, %404 : vector<2x128xi1>, vector<2x128xf32>
    %407 = vector.extract_strided_slice %406 {offsets = [0, 0], sizes = [2, 32], strides = [1, 1]} : vector<2x128xf32> to vector<2x32xf32>
    %408 = vector.extract_strided_slice %406 {offsets = [0, 32], sizes = [2, 32], strides = [1, 1]} : vector<2x128xf32> to vector<2x32xf32>
    %409 = vector.extract_strided_slice %406 {offsets = [0, 64], sizes = [2, 32], strides = [1, 1]} : vector<2x128xf32> to vector<2x32xf32>
    %410 = vector.extract_strided_slice %406 {offsets = [0, 96], sizes = [2, 32], strides = [1, 1]} : vector<2x128xf32> to vector<2x32xf32>
    %411 = arith.mulf %408, %340 : vector<2x32xf32>
    %412 = arith.mulf %407, %409 : vector<2x32xf32>
    %413 = arith.addf %411, %412 : vector<2x32xf32>
    %414 = math.tanh %413 : vector<2x32xf32>
    %415 = arith.mulf %410, %414 : vector<2x32xf32>
    %c1_153 = arith.constant 1 : index
    %c0_154 = arith.constant 0 : index
    %c0_155 = arith.constant 0 : index
    %416 = vector.load %arg1[%c1_153, %c0_154, %c0_155] : memref<3x32x128xf32, #tpu.memory_space<vmem>>, vector<1x32x128xf32>
    %417 = vector.shape_cast %416 : vector<1x32x128xf32> to vector<32x128xf32>
    %cst_156 = arith.constant dense<0.000000e+00> : vector<2x128xf32>
    %418 = tpu.matmul %415, %417, %cst_156 {dimension_numbers = #tpu.dot_dimension_numbers<[1], [0], [0], [1], [0, 0, 1, 1], [], []>} : vector<2x32xf32>, vector<32x128xf32>, vector<2x128xf32> -> vector<2x128xf32>
    %c1_157 = arith.constant 1 : index
    %c0_158 = arith.constant 0 : index
    %c0_159 = arith.constant 0 : index
    %419 = vector.load %arg2[%c1_157, %c0_158, %c0_159] : memref<3x32x128xf32, #tpu.memory_space<vmem>>, vector<1x32x128xf32>
    %420 = vector.shape_cast %419 : vector<1x32x128xf32> to vector<32x128xf32>
    %cst_160 = arith.constant dense<0.000000e+00> : vector<2x128xf32>
    %421 = tpu.matmul %367, %420, %cst_160 {dimension_numbers = #tpu.dot_dimension_numbers<[1], [0], [0], [1], [0, 0, 1, 1], [], []>} : vector<2x32xf32>, vector<32x128xf32>, vector<2x128xf32> -> vector<2x128xf32>
    %422 = arith.addf %418, %421 : vector<2x128xf32>
    %423 = arith.addf %422, %13 : vector<2x128xf32>
    %cst_161 = arith.constant 0.000000e+00 : f32
    %424 = vector.broadcast %cst_161 : f32 to vector<2x128xf32>
    %425 = arith.subf %424, %423 : vector<2x128xf32>
    %426 = math.exp %425 : vector<2x128xf32>
    %cst_162 = arith.constant 1.000000e+00 : f32
    %427 = vector.broadcast %cst_162 : f32 to vector<2x128xf32>
    %428 = arith.addf %427, %426 : vector<2x128xf32>
    %429 = tpu.reciprocal %428 {approx = true} : vector<2x128xf32> -> vector<2x128xf32>
    %430 = math.tanh %423 : vector<2x128xf32>
    %431 = arith.select %5, %430, %429 : vector<2x128xi1>, vector<2x128xf32>
    %432 = vector.extract_strided_slice %431 {offsets = [0, 0], sizes = [2, 32], strides = [1, 1]} : vector<2x128xf32> to vector<2x32xf32>
    %433 = vector.extract_strided_slice %431 {offsets = [0, 32], sizes = [2, 32], strides = [1, 1]} : vector<2x128xf32> to vector<2x32xf32>
    %434 = vector.extract_strided_slice %431 {offsets = [0, 64], sizes = [2, 32], strides = [1, 1]} : vector<2x128xf32> to vector<2x32xf32>
    %435 = vector.extract_strided_slice %431 {offsets = [0, 96], sizes = [2, 32], strides = [1, 1]} : vector<2x128xf32> to vector<2x32xf32>
    %436 = arith.mulf %433, %365 : vector<2x32xf32>
    %437 = arith.mulf %432, %434 : vector<2x32xf32>
    %438 = arith.addf %436, %437 : vector<2x32xf32>
    %439 = math.tanh %438 : vector<2x32xf32>
    %440 = arith.mulf %435, %439 : vector<2x32xf32>
    %c2_163 = arith.constant 2 : index
    %c0_164 = arith.constant 0 : index
    %c0_165 = arith.constant 0 : index
    %441 = vector.load %arg1[%c2_163, %c0_164, %c0_165] : memref<3x32x128xf32, #tpu.memory_space<vmem>>, vector<1x32x128xf32>
    %442 = vector.shape_cast %441 : vector<1x32x128xf32> to vector<32x128xf32>
    %cst_166 = arith.constant dense<0.000000e+00> : vector<2x128xf32>
    %443 = tpu.matmul %440, %442, %cst_166 {dimension_numbers = #tpu.dot_dimension_numbers<[1], [0], [0], [1], [0, 0, 1, 1], [], []>} : vector<2x32xf32>, vector<32x128xf32>, vector<2x128xf32> -> vector<2x128xf32>
    %c2_167 = arith.constant 2 : index
    %c0_168 = arith.constant 0 : index
    %c0_169 = arith.constant 0 : index
    %444 = vector.load %arg2[%c2_167, %c0_168, %c0_169] : memref<3x32x128xf32, #tpu.memory_space<vmem>>, vector<1x32x128xf32>
    %445 = vector.shape_cast %444 : vector<1x32x128xf32> to vector<32x128xf32>
    %cst_170 = arith.constant dense<0.000000e+00> : vector<2x128xf32>
    %446 = tpu.matmul %392, %445, %cst_170 {dimension_numbers = #tpu.dot_dimension_numbers<[1], [0], [0], [1], [0, 0, 1, 1], [], []>} : vector<2x32xf32>, vector<32x128xf32>, vector<2x128xf32> -> vector<2x128xf32>
    %447 = arith.addf %443, %446 : vector<2x128xf32>
    %448 = arith.addf %447, %17 : vector<2x128xf32>
    %cst_171 = arith.constant 0.000000e+00 : f32
    %449 = vector.broadcast %cst_171 : f32 to vector<2x128xf32>
    %450 = arith.subf %449, %448 : vector<2x128xf32>
    %451 = math.exp %450 : vector<2x128xf32>
    %cst_172 = arith.constant 1.000000e+00 : f32
    %452 = vector.broadcast %cst_172 : f32 to vector<2x128xf32>
    %453 = arith.addf %452, %451 : vector<2x128xf32>
    %454 = tpu.reciprocal %453 {approx = true} : vector<2x128xf32> -> vector<2x128xf32>
    %455 = math.tanh %448 : vector<2x128xf32>
    %456 = arith.select %5, %455, %454 : vector<2x128xi1>, vector<2x128xf32>
    %457 = vector.extract_strided_slice %456 {offsets = [0, 0], sizes = [2, 32], strides = [1, 1]} : vector<2x128xf32> to vector<2x32xf32>
    %458 = vector.extract_strided_slice %456 {offsets = [0, 32], sizes = [2, 32], strides = [1, 1]} : vector<2x128xf32> to vector<2x32xf32>
    %459 = vector.extract_strided_slice %456 {offsets = [0, 64], sizes = [2, 32], strides = [1, 1]} : vector<2x128xf32> to vector<2x32xf32>
    %460 = vector.extract_strided_slice %456 {offsets = [0, 96], sizes = [2, 32], strides = [1, 1]} : vector<2x128xf32> to vector<2x32xf32>
    %461 = arith.mulf %458, %390 : vector<2x32xf32>
    %462 = arith.mulf %457, %459 : vector<2x32xf32>
    %463 = arith.addf %461, %462 : vector<2x32xf32>
    %464 = math.tanh %463 : vector<2x32xf32>
    %465 = arith.mulf %460, %464 : vector<2x32xf32>
    %466 = vector.extract_strided_slice %21 {offsets = [12, 0], sizes = [2, 128], strides = [1, 1]} : vector<16x128xf32> to vector<2x128xf32>
    %c0_173 = arith.constant 0 : index
    %c0_174 = arith.constant 0 : index
    %c0_175 = arith.constant 0 : index
    %467 = vector.load %arg2[%c0_173, %c0_174, %c0_175] : memref<3x32x128xf32, #tpu.memory_space<vmem>>, vector<1x32x128xf32>
    %468 = vector.shape_cast %467 : vector<1x32x128xf32> to vector<32x128xf32>
    %cst_176 = arith.constant dense<0.000000e+00> : vector<2x128xf32>
    %469 = tpu.matmul %415, %468, %cst_176 {dimension_numbers = #tpu.dot_dimension_numbers<[1], [0], [0], [1], [0, 0, 1, 1], [], []>} : vector<2x32xf32>, vector<32x128xf32>, vector<2x128xf32> -> vector<2x128xf32>
    %470 = arith.addf %466, %469 : vector<2x128xf32>
    %471 = arith.addf %470, %9 : vector<2x128xf32>
    %cst_177 = arith.constant 0.000000e+00 : f32
    %472 = vector.broadcast %cst_177 : f32 to vector<2x128xf32>
    %473 = arith.subf %472, %471 : vector<2x128xf32>
    %474 = math.exp %473 : vector<2x128xf32>
    %cst_178 = arith.constant 1.000000e+00 : f32
    %475 = vector.broadcast %cst_178 : f32 to vector<2x128xf32>
    %476 = arith.addf %475, %474 : vector<2x128xf32>
    %477 = tpu.reciprocal %476 {approx = true} : vector<2x128xf32> -> vector<2x128xf32>
    %478 = math.tanh %471 : vector<2x128xf32>
    %479 = arith.select %5, %478, %477 : vector<2x128xi1>, vector<2x128xf32>
    %480 = vector.extract_strided_slice %479 {offsets = [0, 0], sizes = [2, 32], strides = [1, 1]} : vector<2x128xf32> to vector<2x32xf32>
    %481 = vector.extract_strided_slice %479 {offsets = [0, 32], sizes = [2, 32], strides = [1, 1]} : vector<2x128xf32> to vector<2x32xf32>
    %482 = vector.extract_strided_slice %479 {offsets = [0, 64], sizes = [2, 32], strides = [1, 1]} : vector<2x128xf32> to vector<2x32xf32>
    %483 = vector.extract_strided_slice %479 {offsets = [0, 96], sizes = [2, 32], strides = [1, 1]} : vector<2x128xf32> to vector<2x32xf32>
    %484 = arith.mulf %481, %413 : vector<2x32xf32>
    %485 = arith.mulf %480, %482 : vector<2x32xf32>
    %486 = arith.addf %484, %485 : vector<2x32xf32>
    %487 = math.tanh %486 : vector<2x32xf32>
    %488 = arith.mulf %483, %487 : vector<2x32xf32>
    %c1_179 = arith.constant 1 : index
    %c0_180 = arith.constant 0 : index
    %c0_181 = arith.constant 0 : index
    %489 = vector.load %arg1[%c1_179, %c0_180, %c0_181] : memref<3x32x128xf32, #tpu.memory_space<vmem>>, vector<1x32x128xf32>
    %490 = vector.shape_cast %489 : vector<1x32x128xf32> to vector<32x128xf32>
    %cst_182 = arith.constant dense<0.000000e+00> : vector<2x128xf32>
    %491 = tpu.matmul %488, %490, %cst_182 {dimension_numbers = #tpu.dot_dimension_numbers<[1], [0], [0], [1], [0, 0, 1, 1], [], []>} : vector<2x32xf32>, vector<32x128xf32>, vector<2x128xf32> -> vector<2x128xf32>
    %c1_183 = arith.constant 1 : index
    %c0_184 = arith.constant 0 : index
    %c0_185 = arith.constant 0 : index
    %492 = vector.load %arg2[%c1_183, %c0_184, %c0_185] : memref<3x32x128xf32, #tpu.memory_space<vmem>>, vector<1x32x128xf32>
    %493 = vector.shape_cast %492 : vector<1x32x128xf32> to vector<32x128xf32>
    %cst_186 = arith.constant dense<0.000000e+00> : vector<2x128xf32>
    %494 = tpu.matmul %440, %493, %cst_186 {dimension_numbers = #tpu.dot_dimension_numbers<[1], [0], [0], [1], [0, 0, 1, 1], [], []>} : vector<2x32xf32>, vector<32x128xf32>, vector<2x128xf32> -> vector<2x128xf32>
    %495 = arith.addf %491, %494 : vector<2x128xf32>
    %496 = arith.addf %495, %13 : vector<2x128xf32>
    %cst_187 = arith.constant 0.000000e+00 : f32
    %497 = vector.broadcast %cst_187 : f32 to vector<2x128xf32>
    %498 = arith.subf %497, %496 : vector<2x128xf32>
    %499 = math.exp %498 : vector<2x128xf32>
    %cst_188 = arith.constant 1.000000e+00 : f32
    %500 = vector.broadcast %cst_188 : f32 to vector<2x128xf32>
    %501 = arith.addf %500, %499 : vector<2x128xf32>
    %502 = tpu.reciprocal %501 {approx = true} : vector<2x128xf32> -> vector<2x128xf32>
    %503 = math.tanh %496 : vector<2x128xf32>
    %504 = arith.select %5, %503, %502 : vector<2x128xi1>, vector<2x128xf32>
    %505 = vector.extract_strided_slice %504 {offsets = [0, 0], sizes = [2, 32], strides = [1, 1]} : vector<2x128xf32> to vector<2x32xf32>
    %506 = vector.extract_strided_slice %504 {offsets = [0, 32], sizes = [2, 32], strides = [1, 1]} : vector<2x128xf32> to vector<2x32xf32>
    %507 = vector.extract_strided_slice %504 {offsets = [0, 64], sizes = [2, 32], strides = [1, 1]} : vector<2x128xf32> to vector<2x32xf32>
    %508 = vector.extract_strided_slice %504 {offsets = [0, 96], sizes = [2, 32], strides = [1, 1]} : vector<2x128xf32> to vector<2x32xf32>
    %509 = arith.mulf %506, %438 : vector<2x32xf32>
    %510 = arith.mulf %505, %507 : vector<2x32xf32>
    %511 = arith.addf %509, %510 : vector<2x32xf32>
    %512 = math.tanh %511 : vector<2x32xf32>
    %513 = arith.mulf %508, %512 : vector<2x32xf32>
    %c2_189 = arith.constant 2 : index
    %c0_190 = arith.constant 0 : index
    %c0_191 = arith.constant 0 : index
    %514 = vector.load %arg1[%c2_189, %c0_190, %c0_191] : memref<3x32x128xf32, #tpu.memory_space<vmem>>, vector<1x32x128xf32>
    %515 = vector.shape_cast %514 : vector<1x32x128xf32> to vector<32x128xf32>
    %cst_192 = arith.constant dense<0.000000e+00> : vector<2x128xf32>
    %516 = tpu.matmul %513, %515, %cst_192 {dimension_numbers = #tpu.dot_dimension_numbers<[1], [0], [0], [1], [0, 0, 1, 1], [], []>} : vector<2x32xf32>, vector<32x128xf32>, vector<2x128xf32> -> vector<2x128xf32>
    %c2_193 = arith.constant 2 : index
    %c0_194 = arith.constant 0 : index
    %c0_195 = arith.constant 0 : index
    %517 = vector.load %arg2[%c2_193, %c0_194, %c0_195] : memref<3x32x128xf32, #tpu.memory_space<vmem>>, vector<1x32x128xf32>
    %518 = vector.shape_cast %517 : vector<1x32x128xf32> to vector<32x128xf32>
    %cst_196 = arith.constant dense<0.000000e+00> : vector<2x128xf32>
    %519 = tpu.matmul %465, %518, %cst_196 {dimension_numbers = #tpu.dot_dimension_numbers<[1], [0], [0], [1], [0, 0, 1, 1], [], []>} : vector<2x32xf32>, vector<32x128xf32>, vector<2x128xf32> -> vector<2x128xf32>
    %520 = arith.addf %516, %519 : vector<2x128xf32>
    %521 = arith.addf %520, %17 : vector<2x128xf32>
    %cst_197 = arith.constant 0.000000e+00 : f32
    %522 = vector.broadcast %cst_197 : f32 to vector<2x128xf32>
    %523 = arith.subf %522, %521 : vector<2x128xf32>
    %524 = math.exp %523 : vector<2x128xf32>
    %cst_198 = arith.constant 1.000000e+00 : f32
    %525 = vector.broadcast %cst_198 : f32 to vector<2x128xf32>
    %526 = arith.addf %525, %524 : vector<2x128xf32>
    %527 = tpu.reciprocal %526 {approx = true} : vector<2x128xf32> -> vector<2x128xf32>
    %528 = math.tanh %521 : vector<2x128xf32>
    %529 = arith.select %5, %528, %527 : vector<2x128xi1>, vector<2x128xf32>
    %530 = vector.extract_strided_slice %529 {offsets = [0, 0], sizes = [2, 32], strides = [1, 1]} : vector<2x128xf32> to vector<2x32xf32>
    %531 = vector.extract_strided_slice %529 {offsets = [0, 32], sizes = [2, 32], strides = [1, 1]} : vector<2x128xf32> to vector<2x32xf32>
    %532 = vector.extract_strided_slice %529 {offsets = [0, 64], sizes = [2, 32], strides = [1, 1]} : vector<2x128xf32> to vector<2x32xf32>
    %533 = vector.extract_strided_slice %529 {offsets = [0, 96], sizes = [2, 32], strides = [1, 1]} : vector<2x128xf32> to vector<2x32xf32>
    %534 = arith.mulf %531, %463 : vector<2x32xf32>
    %535 = arith.mulf %530, %532 : vector<2x32xf32>
    %536 = arith.addf %534, %535 : vector<2x32xf32>
    %537 = math.tanh %536 : vector<2x32xf32>
    %538 = arith.mulf %533, %537 : vector<2x32xf32>
    %539 = vector.extract_strided_slice %21 {offsets = [14, 0], sizes = [2, 128], strides = [1, 1]} : vector<16x128xf32> to vector<2x128xf32>
    %c0_199 = arith.constant 0 : index
    %c0_200 = arith.constant 0 : index
    %c0_201 = arith.constant 0 : index
    %540 = vector.load %arg2[%c0_199, %c0_200, %c0_201] : memref<3x32x128xf32, #tpu.memory_space<vmem>>, vector<1x32x128xf32>
    %541 = vector.shape_cast %540 : vector<1x32x128xf32> to vector<32x128xf32>
    %cst_202 = arith.constant dense<0.000000e+00> : vector<2x128xf32>
    %542 = tpu.matmul %488, %541, %cst_202 {dimension_numbers = #tpu.dot_dimension_numbers<[1], [0], [0], [1], [0, 0, 1, 1], [], []>} : vector<2x32xf32>, vector<32x128xf32>, vector<2x128xf32> -> vector<2x128xf32>
    %543 = arith.addf %539, %542 : vector<2x128xf32>
    %544 = arith.addf %543, %9 : vector<2x128xf32>
    %cst_203 = arith.constant 0.000000e+00 : f32
    %545 = vector.broadcast %cst_203 : f32 to vector<2x128xf32>
    %546 = arith.subf %545, %544 : vector<2x128xf32>
    %547 = math.exp %546 : vector<2x128xf32>
    %cst_204 = arith.constant 1.000000e+00 : f32
    %548 = vector.broadcast %cst_204 : f32 to vector<2x128xf32>
    %549 = arith.addf %548, %547 : vector<2x128xf32>
    %550 = tpu.reciprocal %549 {approx = true} : vector<2x128xf32> -> vector<2x128xf32>
    %551 = math.tanh %544 : vector<2x128xf32>
    %552 = arith.select %5, %551, %550 : vector<2x128xi1>, vector<2x128xf32>
    %553 = vector.extract_strided_slice %552 {offsets = [0, 0], sizes = [2, 32], strides = [1, 1]} : vector<2x128xf32> to vector<2x32xf32>
    %554 = vector.extract_strided_slice %552 {offsets = [0, 32], sizes = [2, 32], strides = [1, 1]} : vector<2x128xf32> to vector<2x32xf32>
    %555 = vector.extract_strided_slice %552 {offsets = [0, 64], sizes = [2, 32], strides = [1, 1]} : vector<2x128xf32> to vector<2x32xf32>
    %556 = vector.extract_strided_slice %552 {offsets = [0, 96], sizes = [2, 32], strides = [1, 1]} : vector<2x128xf32> to vector<2x32xf32>
    %557 = arith.mulf %554, %486 : vector<2x32xf32>
    %558 = arith.mulf %553, %555 : vector<2x32xf32>
    %559 = arith.addf %557, %558 : vector<2x32xf32>
    %560 = math.tanh %559 : vector<2x32xf32>
    %561 = arith.mulf %556, %560 : vector<2x32xf32>
    %c1_205 = arith.constant 1 : index
    %c0_206 = arith.constant 0 : index
    %c0_207 = arith.constant 0 : index
    %562 = vector.load %arg1[%c1_205, %c0_206, %c0_207] : memref<3x32x128xf32, #tpu.memory_space<vmem>>, vector<1x32x128xf32>
    %563 = vector.shape_cast %562 : vector<1x32x128xf32> to vector<32x128xf32>
    %cst_208 = arith.constant dense<0.000000e+00> : vector<2x128xf32>
    %564 = tpu.matmul %561, %563, %cst_208 {dimension_numbers = #tpu.dot_dimension_numbers<[1], [0], [0], [1], [0, 0, 1, 1], [], []>} : vector<2x32xf32>, vector<32x128xf32>, vector<2x128xf32> -> vector<2x128xf32>
    %c1_209 = arith.constant 1 : index
    %c0_210 = arith.constant 0 : index
    %c0_211 = arith.constant 0 : index
    %565 = vector.load %arg2[%c1_209, %c0_210, %c0_211] : memref<3x32x128xf32, #tpu.memory_space<vmem>>, vector<1x32x128xf32>
    %566 = vector.shape_cast %565 : vector<1x32x128xf32> to vector<32x128xf32>
    %cst_212 = arith.constant dense<0.000000e+00> : vector<2x128xf32>
    %567 = tpu.matmul %513, %566, %cst_212 {dimension_numbers = #tpu.dot_dimension_numbers<[1], [0], [0], [1], [0, 0, 1, 1], [], []>} : vector<2x32xf32>, vector<32x128xf32>, vector<2x128xf32> -> vector<2x128xf32>
    %568 = arith.addf %564, %567 : vector<2x128xf32>
    %569 = arith.addf %568, %13 : vector<2x128xf32>
    %cst_213 = arith.constant 0.000000e+00 : f32
    %570 = vector.broadcast %cst_213 : f32 to vector<2x128xf32>
    %571 = arith.subf %570, %569 : vector<2x128xf32>
    %572 = math.exp %571 : vector<2x128xf32>
    %cst_214 = arith.constant 1.000000e+00 : f32
    %573 = vector.broadcast %cst_214 : f32 to vector<2x128xf32>
    %574 = arith.addf %573, %572 : vector<2x128xf32>
    %575 = tpu.reciprocal %574 {approx = true} : vector<2x128xf32> -> vector<2x128xf32>
    %576 = math.tanh %569 : vector<2x128xf32>
    %577 = arith.select %5, %576, %575 : vector<2x128xi1>, vector<2x128xf32>
    %578 = vector.extract_strided_slice %577 {offsets = [0, 0], sizes = [2, 32], strides = [1, 1]} : vector<2x128xf32> to vector<2x32xf32>
    %579 = vector.extract_strided_slice %577 {offsets = [0, 32], sizes = [2, 32], strides = [1, 1]} : vector<2x128xf32> to vector<2x32xf32>
    %580 = vector.extract_strided_slice %577 {offsets = [0, 64], sizes = [2, 32], strides = [1, 1]} : vector<2x128xf32> to vector<2x32xf32>
    %581 = vector.extract_strided_slice %577 {offsets = [0, 96], sizes = [2, 32], strides = [1, 1]} : vector<2x128xf32> to vector<2x32xf32>
    %582 = arith.mulf %579, %511 : vector<2x32xf32>
    %583 = arith.mulf %578, %580 : vector<2x32xf32>
    %584 = arith.addf %582, %583 : vector<2x32xf32>
    %585 = math.tanh %584 : vector<2x32xf32>
    %586 = arith.mulf %581, %585 : vector<2x32xf32>
    %c2_215 = arith.constant 2 : index
    %c0_216 = arith.constant 0 : index
    %c0_217 = arith.constant 0 : index
    %587 = vector.load %arg1[%c2_215, %c0_216, %c0_217] : memref<3x32x128xf32, #tpu.memory_space<vmem>>, vector<1x32x128xf32>
    %588 = vector.shape_cast %587 : vector<1x32x128xf32> to vector<32x128xf32>
    %cst_218 = arith.constant dense<0.000000e+00> : vector<2x128xf32>
    %589 = tpu.matmul %586, %588, %cst_218 {dimension_numbers = #tpu.dot_dimension_numbers<[1], [0], [0], [1], [0, 0, 1, 1], [], []>} : vector<2x32xf32>, vector<32x128xf32>, vector<2x128xf32> -> vector<2x128xf32>
    %c2_219 = arith.constant 2 : index
    %c0_220 = arith.constant 0 : index
    %c0_221 = arith.constant 0 : index
    %590 = vector.load %arg2[%c2_219, %c0_220, %c0_221] : memref<3x32x128xf32, #tpu.memory_space<vmem>>, vector<1x32x128xf32>
    %591 = vector.shape_cast %590 : vector<1x32x128xf32> to vector<32x128xf32>
    %cst_222 = arith.constant dense<0.000000e+00> : vector<2x128xf32>
    %592 = tpu.matmul %538, %591, %cst_222 {dimension_numbers = #tpu.dot_dimension_numbers<[1], [0], [0], [1], [0, 0, 1, 1], [], []>} : vector<2x32xf32>, vector<32x128xf32>, vector<2x128xf32> -> vector<2x128xf32>
    %593 = arith.addf %589, %592 : vector<2x128xf32>
    %594 = arith.addf %593, %17 : vector<2x128xf32>
    %cst_223 = arith.constant 0.000000e+00 : f32
    %595 = vector.broadcast %cst_223 : f32 to vector<2x128xf32>
    %596 = arith.subf %595, %594 : vector<2x128xf32>
    %597 = math.exp %596 : vector<2x128xf32>
    %cst_224 = arith.constant 1.000000e+00 : f32
    %598 = vector.broadcast %cst_224 : f32 to vector<2x128xf32>
    %599 = arith.addf %598, %597 : vector<2x128xf32>
    %600 = tpu.reciprocal %599 {approx = true} : vector<2x128xf32> -> vector<2x128xf32>
    %601 = math.tanh %594 : vector<2x128xf32>
    %602 = arith.select %5, %601, %600 : vector<2x128xi1>, vector<2x128xf32>
    %603 = vector.extract_strided_slice %602 {offsets = [0, 0], sizes = [2, 32], strides = [1, 1]} : vector<2x128xf32> to vector<2x32xf32>
    %604 = vector.extract_strided_slice %602 {offsets = [0, 32], sizes = [2, 32], strides = [1, 1]} : vector<2x128xf32> to vector<2x32xf32>
    %605 = vector.extract_strided_slice %602 {offsets = [0, 64], sizes = [2, 32], strides = [1, 1]} : vector<2x128xf32> to vector<2x32xf32>
    %606 = vector.extract_strided_slice %602 {offsets = [0, 96], sizes = [2, 32], strides = [1, 1]} : vector<2x128xf32> to vector<2x32xf32>
    %607 = arith.mulf %604, %536 : vector<2x32xf32>
    %608 = arith.mulf %603, %605 : vector<2x32xf32>
    %609 = arith.addf %607, %608 : vector<2x32xf32>
    %610 = math.tanh %609 : vector<2x32xf32>
    %611 = arith.mulf %606, %610 : vector<2x32xf32>
    %c0_225 = arith.constant 0 : index
    %c0_226 = arith.constant 0 : index
    %612 = vector.load %arg4[%c0_225, %c0_226] : memref<32x128xf32, #tpu.memory_space<vmem>>, vector<32x128xf32>
    %cst_227 = arith.constant dense<0.000000e+00> : vector<2x128xf32>
    %613 = tpu.matmul %611, %612, %cst_227 {dimension_numbers = #tpu.dot_dimension_numbers<[1], [0], [0], [1], [0, 0, 1, 1], [], []>} : vector<2x32xf32>, vector<32x128xf32>, vector<2x128xf32> -> vector<2x128xf32>
    %c0_228 = arith.constant 0 : index
    %c0_229 = arith.constant 0 : index
    %614 = vector.load %arg5[%c0_228, %c0_229] : memref<1x128xf32, #tpu.memory_space<vmem>>, vector<1x128xf32>
    %615 = vector.broadcast %614 : vector<1x128xf32> to vector<2x128xf32>
    %616 = arith.addf %613, %615 : vector<2x128xf32>
    %c0_230 = arith.constant 0 : index
    %c0_231 = arith.constant 0 : index
    %617 = vector.load %arg6[%c0_230, %c0_231] : memref<2x128xf32, #tpu.memory_space<vmem>>, vector<2x128xf32>
    tpu.vector_store %arg6[%c0_230, %c0_231], %616 {strides = array<i32>} : memref<2x128xf32, #tpu.memory_space<vmem>>, vector<2x128xf32>,
    return
  }
}

</mosaic_0001>

<bundles_post_ra>
// kernel: lstm_model_forward.1
= control target key start
LH: loop header
LB: loop body
LE: loop exit
PB: predicated region body
PF: predicated region fallthrough
CT: control target
= control target key end

     0   :  { %s2763_s0 = inlined_call_operand.vmem [shape: f32[16,32], index: 0, kind: input, shape index: {}]   ;;  %s2764_s1 = inlined_call_operand.vmem [shape: f32[3,32,128], index: 1, kind: input, shape index: {}]   ;;  %s2765_s2 = inlined_call_operand.vmem [shape: f32[3,32,128], index: 2, kind: input, shape index: {}]   ;;  %s2766_s3 = inlined_call_operand.vmem [shape: f32[3,1,128], index: 3, kind: input, shape index: {}]   ;;  %s2767_s4 = inlined_call_operand.vmem [shape: f32[32,128], index: 4, kind: input, shape index: {}]   ;;  %s2768_s5 = inlined_call_operand.vmem [shape: f32[1,128], index: 5, kind: input, shape index: {}]   ;;  %s2769_s6 = inlined_call_operand.hbm [shape: f32[2,128], index: 6, kind: output, shape index: {}]  }
   0x1   :  { %v48_v0 = vld [vmem:[%s2764_s1 + $0x18] sm:$0xff]  ;;  %v47_v2 = vld [vmem:[%s2764_s1 + $0x10] sm:$0xff]  ;;  %v46_v4 = vld [vmem:[%s2764_s1 + $0x8] sm:$0xff] }
   0x2   :  { %v2072_v1 = vld [vmem:[%s2765_s2 + $0x18] sm:$0xff]  ;;  %68 = vmatpush.msra.mxu0 %v48_v0  ;;  %v2081_v3 = vld [vmem:[%s2765_s2 + $0x10] sm:$0xff]  ;;  %v2089_v5 = vld [vmem:[%s2765_s2 + $0x8] sm:$0xff] }
   0x3   :  { %98 = vmatpush.msra.mxu1 %v2072_v1  ;;  %v45_v6 = vld [vmem:[%s2764_s1] sm:$0xff] }
   0x4   :  { %69 = vmatpush.msra.mxu0 %v47_v2  ;;  %v2098_v7 = vld [vmem:[%s2765_s2] sm:$0xff] }
   0x5   :  { %99 = vmatpush.msra.mxu1 %v2081_v3 }
   0x6   :  { %11 = vsyncpa [#allocation3], 0  ;;  %70 = vmatpush.msra.mxu0 %v46_v4  ;;  %v43_v8 = vld [vmem:[%s2763_s0] sm:$0xff]  ;;  %vm49_vm0 = vcmask 261120   ;;  %v2027_v9 = vmov 0.0   ;;  %v24_v17 = vlaneseq  ;;  %s2028_s17 = smov 64  }
   0x7   :  { %100 = vmatpush.msra.mxu1 %v2089_v5  ;;  %v2110_v10 = vld [vmem:[%s2766_s3] ss:$0 sm:$0xff]  ;;  %s2029_s18 = smov 32   ;;  %v2131_v31 = vld [vmem:[%s2765_s2 + $0x38] sm:$0xff]  ;;  %v2141_v33 = vld [vmem:[%s2765_s2 + $0x30] sm:$0xff]  ;;  %s2030_s8 = smov [#allocation2]  }
   0x8   :  { %71 = vmatpush.msra.mxu0 %v45_v6  ;;  %v25_v19 = vand.u32 127, %v24_v17  ;;  %v2136_v32 = vld [vmem:[%s2764_s1 + $0x38] sm:$0xff]  ;;  %154 = vmatpush.msra.mxu2 %v2131_v31  ;;  %v2148_v34 = vld [vmem:[%s2764_s1 + $0x30] sm:$0xff]  ;;  %v2153_v35 = vld [vmem:[%s2765_s2 + $0x28] sm:$0xff]  ;;  %s1715_s11 = sshll.u32 %s2769_s6, 4  ;;  %s1716_s11 = int_to_ptr.hbm [resolvable:$true] %s1715_s11 }
   0x9   :  { %101 = vmatpush.msra.mxu1 %v2098_v7  ;;  %1726 = vmatmul.msk.f32.vlgmr.msra.gmra.mxu0 %vm49_vm0, %v43_v8  ;;  %v2158_v36 = vld [vmem:[%s2764_s1 + $0x28] sm:$0xff]  ;;  %v2166_v37 = vld [vmem:[%s2765_s2 + $0x20] sm:$0xff]  ;;  %v1676_v21 = vld [vmem:[%s2767_s4 + $0x10] sm:$0xff] }
   0xa   :  { %102 = vmatmul.f32.vlgmr.msra.gmra.mxu1 %v2027_v9  ;;  %vm26_vm1 = vcmp.ge.s32.totalorder %v25_v19, 64  ;;  %vm27_vm2 = vcmp.lt.s32.totalorder %v25_v19, 96  ;;  %179 = vmatpush.msra.mxu3 %v2136_v32  ;;  %v2171_v38 = vld [vmem:[%s2764_s1 + $0x20] sm:$0xff] }
   0xb   :  { %vm2116_vm3 = vmand %vm26_vm1, %vm27_vm2  ;;  %356 = vmatpush.msrb.mxu0 %v2131_v31  ;;  %155 = vmatpush.msra.mxu2 %v2141_v33  ;;  %v2195_v43 = vld [vmem:[%s2766_s3 + $0x1] ss:$0 sm:$0xff] }
   0xc   :  { %180 = vmatpush.msra.mxu3 %v2148_v34 }
   0xd   :  { %357 = vmatpush.msrb.mxu0 %v2141_v33  ;;  %156 = vmatpush.msra.mxu2 %v2153_v35 }
   0xe   :  { %181 = vmatpush.msra.mxu3 %v2158_v36 }
   0xf   :  { %358 = vmatpush.msrb.mxu0 %v2153_v35  ;;  %157 = vmatpush.msra.mxu2 %v2166_v37 }
  0x10   :  { %182 = vmatpush.msra.mxu3 %v2171_v38  ;;  %158 = vmatmul.f32.vlgmr.msra.gmra.mxu2 %v2027_v9 }
  0x11   :  { %359 = vmatpush.msrb.mxu0 %v2166_v37 }
  0x12   :  { %304 = vmatpush.msrb.mxu3 %v2072_v1 }
  0x13   :  { %502 = vmatpush.msra.mxu0 %v2072_v1 }
  0x14   :  { %305 = vmatpush.msrb.mxu3 %v2081_v3 }
  0x15   :  { %503 = vmatpush.msra.mxu0 %v2081_v3 }
  0x16   :  { %306 = vmatpush.msrb.mxu3 %v2089_v5 }
  0x17   :  { %504 = vmatpush.msra.mxu0 %v2089_v5 }
  0x18   :  { %307 = vmatpush.msrb.mxu3 %v2098_v7 }
  0x19   :  { %505 = vmatpush.msra.mxu0 %v2098_v7 }
  0x86   :  { %v2112_v11 = vpop.f32.mrf.mxu0 }
  0x87   :  { %v103_v12 = vpop.f32.mrf.mxu1 }
  0x88   :  { %v106_v13 = vadd.f32 %v103_v12, %v2112_v11 }
  0x8a   :  { %v107_v14 = vadd.f32 %v2110_v10, %v106_v13 }
  0x8c   :  { %v108_v15 = vsub.f32 0.0, %v107_v14 }
  0x8e   :  { %v109_v16 = vmul.f32 1.442695, %v108_v15 }
  0x90   :  { %1790 = vpow2.f32 %v109_v16 }
  0x91   :  { %1792 = vtanh.f32 %v107_v14 }
  0x93   :  { %v159_v42 = vpop.f32.mrf.mxu2 }
  0x96   :  { %v1791_v18 = vpop.eup %1790 }
  0x97   :  { %v111_v20 = vadd.f32 1.0, %v1791_v18  ;;  %v1793_v22 = vpop.eup %1792 }
  0x99   :  { %1794 = vrcp.f32 %v111_v20 }
  0x9f   :  { %v1795_v23 = vpop.eup %1794 }
  0xa0   :  { %v114_v24 = vsel %vm2116_vm3, %v1793_v22, %v1795_v23 }
  0xa1   :  { %117 = vrot.lane.b32.xlu0 %v114_v24, %s2028_s17  ;;  %v115_v27 = vmul.f32 0.0, %v114_v24 }
 0x113   :  { %v118_v25 = vpop.permute.xlu0 %117 }
 0x114   :  { %v120_v26 = vmul.f32 %v118_v25, %v114_v24  ;;  %v2224_v25 = vld [vmem:[%s2764_s1 + $0x58] sm:$0xff] }
 0x115   :  { %259 = vmatpush.msrb.mxu2 %v2224_v25 }
 0x116   :  { %122 = vrot.lane.b32.xlu0 %v120_v26, %s2029_s18  ;;  %v2229_v26 = vld [vmem:[%s2764_s1 + $0x50] sm:$0xff] }
 0x117   :  { %260 = vmatpush.msrb.mxu2 %v2229_v26 }
 0x188   :  { %v123_v28 = vpop.permute.xlu0 %122 }
 0x189   :  { %v2124_v29 = vadd.f32 %v123_v28, %v115_v27  ;;  %v2236_v27 = vld [vmem:[%s2765_s2 + $0x58] sm:$0xff]  ;;  %v2241_v28 = vld [vmem:[%s2765_s2 + $0x50] sm:$0xff] }
 0x18a   :  { %234 = vmatpush.msrb.mxu1 %v2236_v27 }
 0x18b   :  { %1796 = vtanh.f32 %v2124_v29  ;;  %v325_v15 = vrot.slane %v2124_v29, 6  ;;  %v2247_v29 = vld [vmem:[%s2764_s1 + $0x48] sm:$0xff] }
 0x18c   :  { %235 = vmatpush.msrb.mxu1 %v2241_v28  ;;  %261 = vmatpush.msrb.mxu2 %v2247_v29 }
 0x191   :  { %v1797_v30 = vpop.eup %1796 }
 0x192   :  { %128 = vrot.lane.b32.xlu1 %v1797_v30, %s2028_s17  ;;  %v2255_v30 = vld [vmem:[%s2764_s1 + $0x40] sm:$0xff] }
 0x193   :  { %262 = vmatpush.msrb.mxu2 %v2255_v30 }
 0x195   :  { %432 = vmatpush.msra.mxu2 %v2236_v27 }
 0x197   :  { %433 = vmatpush.msra.mxu2 %v2241_v28 }
 0x204   :  { %v129_v39 = vpop.permute.xlu1 %128 }
 0x205   :  { %v131_v40 = vmul.f32 %v129_v39, %v114_v24  ;;  %v44_v24 = vld [vmem:[%s2763_s0 + $0x8] sm:$0xff] }
 0x206   :  { %1727 = vmatmul.msk.f32.gmra.mxu0 %vm49_vm0, %v44_v24 }
 0x207   :  { %163 = vrot.lane.b32.xlu1 %v131_v40, %s2029_s18 }
 0x279   :  { %v164_v41 = vpop.permute.xlu1 %163 }
 0x27a   :  { %1736 = vmatmul.msk.f32.vlgmr.msra.gmra.mxu3 %vm49_vm0, %v164_v41 }
 0x27b   :  { %457 = vmatpush.msra.mxu3 %v2224_v25 }
 0x27d   :  { %458 = vmatpush.msra.mxu3 %v2229_v26 }
 0x27f   :  { %459 = vmatpush.msra.mxu3 %v2247_v29 }
 0x281   :  { %460 = vmatpush.msra.mxu3 %v2255_v30 }
 0x282   :  { %1746 = vmatmul.msk.f32.vlgmr.msrb.gmra.mxu3 %vm49_vm0, %v164_v41 }
 0x283   :  { %630 = vmatpush.msrb.mxu3 %v2236_v27 }
 0x285   :  { %631 = vmatpush.msrb.mxu3 %v2241_v28 }
 0x2fd   :  { %v184_v44 = vpop.f32.mrf.mxu3 }
 0x2fe   :  { %v185_v45 = vadd.f32 %v184_v44, %v159_v42  ;;  %v2270_v42 = vld [vmem:[%s2765_s2 + $0x48] sm:$0xff]  ;;  %v2276_v44 = vld [vmem:[%s2765_s2 + $0x40] sm:$0xff] }
 0x2ff   :  { %236 = vmatpush.msrb.mxu1 %v2270_v42  ;;  %434 = vmatpush.msra.mxu2 %v2270_v42 }
 0x300   :  { %v187_v46 = vadd.f32 %v2195_v43, %v185_v45  ;;  %632 = vmatpush.msrb.mxu3 %v2270_v42 }
 0x301   :  { %237 = vmatpush.msrb.mxu1 %v2276_v44  ;;  %435 = vmatpush.msra.mxu2 %v2276_v44 }
 0x302   :  { %v188_v47 = vsub.f32 0.0, %v187_v46  ;;  %238 = vmatmul.f32.vlgmr.msrb.gmra.mxu1 %v2027_v9  ;;  %633 = vmatpush.msrb.mxu3 %v2276_v44 }
 0x303   :  { %382 = vmatpush.msra.mxu1 %v2136_v32 }
 0x304   :  { %v189_v48 = vmul.f32 1.442695, %v188_v47 }
 0x305   :  { %v309_v49 = vpop.f32.mrf.mxu3  ;;  %383 = vmatpush.msra.mxu1 %v2148_v34 }
 0x306   :  { %1798 = vpow2.f32 %v189_v48  ;;  %v313_v50 = vrot.slane %v309_v49, 6  ;;  %v2317_v49 = vld [vmem:[%s2766_s3 + $0x2] ss:$0 sm:$0xff] }
 0x307   :  { %1800 = vtanh.f32 %v187_v46  ;;  %384 = vmatpush.msra.mxu1 %v2158_v36  ;;  %v2312_v46 = vpop.f32.mrf.mxu0 }
 0x308   :  { %v315_v51 = vadd.f32 %v313_v50, %v2112_v11 }
 0x309   :  { %385 = vmatpush.msra.mxu1 %v2171_v38 }
 0x30a   :  { %v316_v52 = vadd.f32 %v2110_v10, %v315_v51 }
 0x30b   :  { %554 = vmatpush.msrb.mxu1 %v2131_v31 }
 0x30c   :  { %v1799_v53 = vpop.eup %1798  ;;  %v317_v54 = vsub.f32 0.0, %v316_v52 }
 0x30d   :  { %v191_v55 = vadd.f32 1.0, %v1799_v53  ;;  %v1801_v57 = vpop.eup %1800  ;;  %555 = vmatpush.msrb.mxu1 %v2141_v33 }
 0x30e   :  { %v318_v56 = vmul.f32 1.442695, %v317_v54 }
 0x30f   :  { %1802 = vrcp.f32 %v191_v55  ;;  %556 = vmatpush.msrb.mxu1 %v2153_v35 }
 0x310   :  { %1804 = vpow2.f32 %v318_v56 }
 0x311   :  { %1806 = vtanh.f32 %v316_v52  ;;  %557 = vmatpush.msrb.mxu1 %v2166_v37 }
 0x315   :  { %v1803_v58 = vpop.eup %1802 }
 0x316   :  { %v1805_v59 = vpop.eup %1804  ;;  %v194_v60 = vsel %vm2116_vm3, %v1801_v57, %v1803_v58 }
 0x317   :  { %v320_v61 = vadd.f32 1.0, %v1805_v59  ;;  %197 = vrot.lane.b32.xlu2 %v194_v60, %s2028_s17  ;;  %v1807_v62 = vpop.eup %1806  ;;  %v195_v12 = vmul.f32 0.0, %v194_v60 }
 0x319   :  { %1808 = vrcp.f32 %v320_v61 }
 0x31f   :  { %v1809_v63 = vpop.eup %1808 }
 0x320   :  { %v323_v0 = vsel %vm2116_vm3, %v1807_v62, %v1809_v63 }
 0x321   :  { %329 = vrot.lane.b32.xlu2 %v323_v0, %s2028_s17  ;;  %v327_v17 = vmul.f32 %v325_v15, %v323_v0 }
 0x371   :  { %v198_v2 = vpop.permute.xlu2 %197 }
 0x372   :  { %v200_v4 = vmul.f32 %v198_v2, %v194_v60 }
 0x374   :  { %202 = vrot.lane.b32.xlu0 %v200_v4, %s2029_s18 }
 0x37b   :  { %v330_v6 = vpop.permute.xlu2 %329 }
 0x37c   :  { %v332_v8 = vmul.f32 %v330_v6, %v323_v0 }
 0x37e   :  { %334 = vrot.lane.b32.xlu1 %v332_v8, %s2029_s18 }
 0x37f   :  { %v239_v47 = vpop.f32.mrf.mxu1 }
 0x3e6   :  { %v203_v13 = vpop.permute.xlu0 %202 }
 0x3e7   :  { %v2208_v14 = vadd.f32 %v203_v13, %v195_v12 }
 0x3e9   :  { %1810 = vtanh.f32 %v2208_v14 }
 0x3ef   :  { %v1811_v16 = vpop.eup %1810 }
 0x3f0   :  { %v335_v18 = vpop.permute.xlu1 %334  ;;  %208 = vrot.lane.b32.xlu2 %v1811_v16, %s2028_s17 }
 0x3f1   :  { %v2213_v19 = vadd.f32 %v335_v18, %v327_v17 }
 0x3f3   :  { %1812 = vtanh.f32 %v2213_v19 }
 0x3f9   :  { %v1813_v20 = vpop.eup %1812 }
 0x3fa   :  { %340 = vrot.lane.b32.xlu0 %v1813_v20, %s2028_s17 }
 0x44a   :  { %v209_v22 = vpop.permute.xlu2 %208 }
 0x44b   :  { %v211_v23 = vmul.f32 %v209_v22, %v194_v60 }
 0x44d   :  { %243 = vrot.lane.b32.xlu1 %v211_v23, %s2029_s18 }
 0x46c   :  { %v341_v39 = vpop.permute.xlu0 %340 }
 0x46d   :  { %v343_v40 = vmul.f32 %v341_v39, %v323_v0 }
 0x46f   :  { %v365_v41 = vrot.slane %v343_v40, 2 }
 0x471   :  { %366 = vrot.lane.b32.xlu2 %v365_v41, %s2029_s18 }
 0x4bf   :  { %v244_v45 = vpop.permute.xlu1 %243 }
 0x4c0   :  { %1745 = vmatmul.msk.f32.vlgmr.msrb.gmra.mxu2 %vm49_vm0, %v244_v45  ;;  %1747 = vmatmul.msk.f32.vlgmr.msrb.gmra.mxu0 %vm49_vm0, %v244_v45 }
 0x4c1   :  { %580 = vmatpush.msrb.mxu2 %v2136_v32  ;;  %655 = vmatpush.msrb.mxu0 %v2224_v25 }
 0x4c3   :  { %581 = vmatpush.msrb.mxu2 %v2148_v34  ;;  %656 = vmatpush.msrb.mxu0 %v2229_v26 }
 0x4c5   :  { %582 = vmatpush.msrb.mxu2 %v2158_v36  ;;  %657 = vmatpush.msrb.mxu0 %v2247_v29 }
 0x4c7   :  { %583 = vmatpush.msrb.mxu2 %v2171_v38  ;;  %658 = vmatpush.msrb.mxu0 %v2255_v30 }
 0x4cb   :  { %v367_v9 = vpop.permute.xlu2 %366 }
 0x4cc   :  { %1748 = vmatmul.msk.f32.vlgmr.msra.gmra.mxu1 %vm49_vm0, %v367_v9  ;;  %1751 = vmatmul.msk.f32.vlgmr.msra.gmra.mxu0 %vm49_vm0, %v367_v9 }
 0x4cd   :  { %700 = vmatpush.msra.mxu1 %v2072_v1  ;;  %828 = vmatpush.msra.mxu0 %v2236_v27 }
 0x4cf   :  { %701 = vmatpush.msra.mxu1 %v2081_v3  ;;  %829 = vmatpush.msra.mxu0 %v2241_v28 }
 0x4d1   :  { %702 = vmatpush.msra.mxu1 %v2089_v5  ;;  %830 = vmatpush.msra.mxu0 %v2270_v42 }
 0x4d3   :  { %703 = vmatpush.msra.mxu1 %v2098_v7  ;;  %831 = vmatpush.msra.mxu0 %v2276_v44 }
 0x53d   :  { %v361_v48 = vpop.f32.mrf.mxu0 }
 0x543   :  { %v264_v50 = vpop.f32.mrf.mxu2 }
 0x544   :  { %v265_v51 = vadd.f32 %v264_v50, %v239_v47 }
 0x546   :  { %v267_v52 = vadd.f32 %v2317_v49, %v265_v51  ;;  %v523_v51 = vrot.slane %v2213_v19, 6 }
 0x548   :  { %v268_v53 = vsub.f32 0.0, %v267_v52 }
 0x549   :  { %v387_v54 = vpop.f32.mrf.mxu1  ;;  %v507_v55 = vpop.f32.mrf.mxu0 }
 0x54a   :  { %v269_v56 = vmul.f32 1.442695, %v268_v53  ;;  %v388_v57 = vadd.f32 %v387_v54, %v361_v48  ;;  %v511_v58 = vrot.slane %v507_v55, 4 }
 0x54c   :  { %1814 = vpow2.f32 %v269_v56  ;;  %v390_v59 = vadd.f32 %v2195_v43, %v388_v57  ;;  %v513_v60 = vadd.f32 %v511_v58, %v2112_v11 }
 0x54e   :  { %v391_v61 = vsub.f32 0.0, %v390_v59  ;;  %v514_v62 = vadd.f32 %v2110_v10, %v513_v60 }
 0x550   :  { %v392_v63 = vmul.f32 1.442695, %v391_v61  ;;  %v515_v0 = vsub.f32 0.0, %v514_v62 }
 0x552   :  { %v1815_v2 = vpop.eup %1814  ;;  %1816 = vpow2.f32 %v392_v63  ;;  %v516_v4 = vmul.f32 1.442695, %v515_v0 }
 0x553   :  { %v271_v6 = vadd.f32 1.0, %v1815_v2  ;;  %1818 = vtanh.f32 %v267_v52 }
 0x554   :  { %1820 = vpow2.f32 %v516_v4 }
 0x555   :  { %1822 = vrcp.f32 %v271_v6 }
 0x556   :  { %1824 = vtanh.f32 %v390_v59 }
 0x558   :  { %v1817_v8 = vpop.eup %1816 }
 0x559   :  { %v1819_v12 = vpop.eup %1818  ;;  %v394_v13 = vadd.f32 1.0, %v1817_v8 }
 0x55a   :  { %v1821_v15 = vpop.eup %1820 }
 0x55b   :  { %v1823_v16 = vpop.eup %1822  ;;  %1826 = vrcp.f32 %v394_v13  ;;  %v518_v17 = vadd.f32 1.0, %v1821_v15 }
 0x55c   :  { %1828 = vtanh.f32 %v514_v62  ;;  %v274_v18 = vsel %vm2116_vm3, %v1819_v12, %v1823_v16  ;;  %v1825_v20 = vpop.eup %1824 }
 0x55d   :  { %1830 = vrcp.f32 %v518_v17  ;;  %277 = vrot.lane.b32.xlu0 %v274_v18, %s2028_s17  ;;  %v275_v56 = vmul.f32 0.0, %v274_v18 }
 0x561   :  { %v1827_v22 = vpop.eup %1826 }
 0x562   :  { %v1829_v23 = vpop.eup %1828  ;;  %v397_v24 = vsel %vm2116_vm3, %v1825_v20, %v1827_v22 }
 0x563   :  { %v1831_v39 = vpop.eup %1830  ;;  %400 = vrot.lane.b32.xlu1 %v397_v24, %s2028_s17  ;;  %v398_v59 = vmul.f32 %v397_v24, %v2208_v14 }
 0x564   :  { %v521_v40 = vsel %vm2116_vm3, %v1829_v23, %v1831_v39 }
 0x565   :  { %527 = vrot.lane.b32.xlu2 %v521_v40, %s2028_s17  ;;  %v525_v52 = vmul.f32 %v523_v51, %v521_v40 }
 0x5bf   :  { %v528_v41 = vpop.permute.xlu2 %527 }
 0x5c0   :  { %v530_v45 = vmul.f32 %v528_v41, %v521_v40 }
 0x5c2   :  { %532 = vrot.lane.b32.xlu2 %v530_v45, %s2029_s18 }
 0x5cf   :  { %v278_v9 = vpop.permute.xlu0 %277 }
 0x5d0   :  { %v280_v47 = vmul.f32 %v278_v9, %v274_v18 }
 0x5d2   :  { %282 = vrot.lane.b32.xlu0 %v280_v47, %s2029_s18 }
 0x5d5   :  { %v401_v48 = vpop.permute.xlu1 %400 }
 0x5d6   :  { %v403_v50 = vmul.f32 %v401_v48, %v397_v24 }
 0x5d8   :  { %405 = vrot.lane.b32.xlu1 %v403_v50, %s2029_s18 }
 0x61c   :  { %v533_v53 = vpop.permute.xlu2 %532 }
 0x61d   :  { %v2336_v54 = vadd.f32 %v533_v53, %v525_v52 }
 0x61f   :  { %1832 = vtanh.f32 %v2336_v54 }
 0x625   :  { %v1833_v55 = vpop.eup %1832 }
 0x626   :  { %538 = vrot.lane.b32.xlu2 %v1833_v55, %s2028_s17 }
 0x644   :  { %v283_v57 = vpop.permute.xlu0 %282 }
 0x645   :  { %v2340_v58 = vadd.f32 %v283_v57, %v275_v56 }
 0x647   :  { %1834 = vtanh.f32 %v2340_v58 }
 0x64a   :  { %v406_v60 = vpop.permute.xlu1 %405 }
 0x64b   :  { %v2344_v61 = vadd.f32 %v406_v60, %v398_v59 }
 0x64d   :  { %v1835_v19 = vpop.eup %1834  ;;  %1836 = vtanh.f32 %v2344_v61 }
 0x64e   :  { %288 = vrot.lane.b32.xlu0 %v1835_v19, %s2028_s17 }
 0x653   :  { %v1837_v62 = vpop.eup %1836 }
 0x654   :  { %411 = vrot.lane.b32.xlu1 %v1837_v62, %s2028_s17 }
 0x680   :  { %v539_v63 = vpop.permute.xlu2 %538 }
 0x681   :  { %v541_v0 = vmul.f32 %v539_v63, %v521_v40 }
 0x683   :  { %v563_v2 = vrot.slane %v541_v0, 4 }
 0x685   :  { %564 = vrot.lane.b32.xlu2 %v563_v2, %s2029_s18 }
 0x6c0   :  { %v289_v4 = vpop.permute.xlu0 %288 }
 0x6c1   :  { %v291_v6 = vmul.f32 %v289_v4, %v274_v18 }
 0x6c3   :  { %416 = vrot.lane.b32.xlu0 %v291_v6, %s2029_s18 }
 0x6c6   :  { %v412_v14 = vpop.permute.xlu1 %411 }
 0x6c7   :  { %v414_v8 = vmul.f32 %v412_v14, %v397_v24 }
 0x6c9   :  { %441 = vrot.lane.b32.xlu1 %v414_v8, %s2029_s18 }
 0x6df   :  { %v565_v15 = vpop.permute.xlu2 %564 }
 0x735   :  { %v417_v12 = vpop.permute.xlu0 %416 }
 0x736   :  { %1749 = vmatmul.msk.f32.vlgmr.msra.gmra.mxu2 %vm49_vm0, %v417_v12 }
 0x737   :  { %752 = vmatpush.msra.mxu2 %v2131_v31 }
 0x739   :  { %753 = vmatpush.msra.mxu2 %v2141_v33 }
 0x73b   :  { %v442_v13 = vpop.permute.xlu1 %441  ;;  %754 = vmatpush.msra.mxu2 %v2153_v35 }
 0x73c   :  { %1750 = vmatmul.msk.f32.vlgmr.msra.gmra.mxu3 %vm49_vm0, %v442_v13  ;;  %1752 = vmatmul.msk.f32.vlgmr.msrb.gmra.mxu1 %vm49_vm0, %v442_v13 }
 0x73d   :  { %755 = vmatpush.msra.mxu2 %v2166_v37  ;;  %778 = vmatpush.msra.mxu3 %v2136_v32 }
 0x73e   :  { %1753 = vmatmul.msk.f32.vlgmr.msrb.gmra.mxu2 %vm49_vm0, %v565_v15  ;;  %853 = vmatpush.msrb.mxu1 %v2224_v25 }
 0x73f   :  { %898 = vmatpush.msrb.mxu2 %v2072_v1  ;;  %779 = vmatpush.msra.mxu3 %v2148_v34 }
 0x740   :  { %854 = vmatpush.msrb.mxu1 %v2229_v26 }
 0x741   :  { %899 = vmatpush.msrb.mxu2 %v2081_v3  ;;  %780 = vmatpush.msra.mxu3 %v2158_v36 }
 0x742   :  { %855 = vmatpush.msrb.mxu1 %v2247_v29 }
 0x743   :  { %900 = vmatpush.msrb.mxu2 %v2089_v5  ;;  %781 = vmatpush.msra.mxu3 %v2171_v38 }
 0x744   :  { %1756 = vmatmul.msk.f32.vlgmr.msra.gmra.mxu1 %vm49_vm0, %v565_v15 }
 0x745   :  { %901 = vmatpush.msrb.mxu2 %v2098_v7  ;;  %856 = vmatpush.msrb.mxu1 %v2255_v30 }
 0x747   :  { %1022 = vmatpush.msra.mxu1 %v2236_v27 }
 0x749   :  { %1023 = vmatpush.msra.mxu1 %v2241_v28 }
 0x74b   :  { %1024 = vmatpush.msra.mxu1 %v2270_v42 }
 0x74d   :  { %1025 = vmatpush.msra.mxu1 %v2276_v44 }
 0x7b9   :  { %v437_v16 = vpop.f32.mrf.mxu2  ;;  %v559_v17 = vpop.f32.mrf.mxu1 }
 0x7bf   :  { %v462_v18 = vpop.f32.mrf.mxu3 }
 0x7c0   :  { %v463_v20 = vadd.f32 %v462_v18, %v437_v16 }
 0x7c1   :  { %v585_v22 = vpop.f32.mrf.mxu2  ;;  %v705_v23 = vpop.f32.mrf.mxu1 }
 0x7c2   :  { %v465_v24 = vadd.f32 %v2317_v49, %v463_v20  ;;  %v586_v39 = vadd.f32 %v585_v22, %v559_v17  ;;  %v709_v40 = vrot.slane %v705_v23, 2 }
 0x7c4   :  { %v466_v41 = vsub.f32 0.0, %v465_v24  ;;  %v588_v45 = vadd.f32 %v2195_v43, %v586_v39  ;;  %v711_v9 = vadd.f32 %v709_v40, %v2112_v11 }
 0x7c6   :  { %v467_v47 = vmul.f32 1.442695, %v466_v41  ;;  %v589_v48 = vsub.f32 0.0, %v588_v45  ;;  %v712_v50 = vadd.f32 %v2110_v10, %v711_v9  ;;  %v721_v41 = vrot.slane %v2336_v54, 6 }
 0x7c8   :  { %1838 = vpow2.f32 %v467_v47  ;;  %v590_v51 = vmul.f32 1.442695, %v589_v48  ;;  %v713_v52 = vsub.f32 0.0, %v712_v50 }
 0x7ca   :  { %1840 = vpow2.f32 %v590_v51  ;;  %v714_v53 = vmul.f32 1.442695, %v713_v52 }
 0x7cc   :  { %1842 = vpow2.f32 %v714_v53 }
 0x7cd   :  { %1844 = vtanh.f32 %v465_v24 }
 0x7ce   :  { %v1839_v55 = vpop.eup %1838 }
 0x7cf   :  { %v469_v56 = vadd.f32 1.0, %v1839_v55 }
 0x7d0   :  { %v1841_v57 = vpop.eup %1840 }
 0x7d1   :  { %1846 = vrcp.f32 %v469_v56  ;;  %v592_v59 = vadd.f32 1.0, %v1841_v57 }
 0x7d2   :  { %v1843_v60 = vpop.eup %1842  ;;  %1848 = vtanh.f32 %v588_v45 }
 0x7d3   :  { %1850 = vrcp.f32 %v592_v59  ;;  %v716_v11 = vadd.f32 1.0, %v1843_v60  ;;  %v1845_v19 = vpop.eup %1844 }
 0x7d4   :  { %1852 = vtanh.f32 %v712_v50 }
 0x7d5   :  { %1854 = vrcp.f32 %v716_v11 }
 0x7d7   :  { %v1847_v62 = vpop.eup %1846 }
 0x7d8   :  { %v1849_v63 = vpop.eup %1848  ;;  %v472_v0 = vsel %vm2116_vm3, %v1845_v19, %v1847_v62 }
 0x7d9   :  { %v1851_v2 = vpop.eup %1850  ;;  %475 = vrot.lane.b32.xlu0 %v472_v0, %s2028_s17  ;;  %v473_v39 = vmul.f32 %v472_v0, %v2340_v58 }
 0x7da   :  { %v1853_v4 = vpop.eup %1852  ;;  %v595_v6 = vsel %vm2116_vm3, %v1849_v63, %v1851_v2 }
 0x7db   :  { %v1855_v14 = vpop.eup %1854  ;;  %598 = vrot.lane.b32.xlu2 %v595_v6, %s2028_s17  ;;  %v596_v20 = vmul.f32 %v595_v6, %v2344_v61 }
 0x7dc   :  { %v719_v8 = vsel %vm2116_vm3, %v1853_v4, %v1855_v14 }
 0x7dd   :  { %725 = vrot.lane.b32.xlu1 %v719_v8, %s2028_s17  ;;  %v723_v9 = vmul.f32 %v721_v41, %v719_v8 }
 0x835   :  { %v599_v12 = vpop.permute.xlu2 %598 }
 0x836   :  { %v601_v13 = vmul.f32 %v599_v12, %v595_v6 }
 0x838   :  { %603 = vrot.lane.b32.xlu2 %v601_v13, %s2029_s18 }
 0x84b   :  { %v476_v15 = vpop.permute.xlu0 %475 }
 0x84c   :  { %v478_v16 = vmul.f32 %v476_v15, %v472_v0 }
 0x84e   :  { %480 = vrot.lane.b32.xlu0 %v478_v16, %s2029_s18 }
 0x84f   :  { %v726_v17 = vpop.permute.xlu1 %725 }
 0x850   :  { %v728_v18 = vmul.f32 %v726_v17, %v719_v8 }
 0x852   :  { %730 = vrot.lane.b32.xlu1 %v728_v18, %s2029_s18 }
 0x892   :  { %v604_v22 = vpop.permute.xlu2 %603 }
 0x893   :  { %v2394_v23 = vadd.f32 %v604_v22, %v596_v20 }
 0x895   :  { %1856 = vtanh.f32 %v2394_v23 }
 0x89b   :  { %v1857_v24 = vpop.eup %1856 }
 0x89c   :  { %609 = vrot.lane.b32.xlu2 %v1857_v24, %s2028_s17 }
 0x8c0   :  { %v481_v40 = vpop.permute.xlu0 %480 }
 0x8c1   :  { %v2400_v45 = vadd.f32 %v481_v40, %v473_v39 }
 0x8c3   :  { %1858 = vtanh.f32 %v2400_v45 }
 0x8c4   :  { %v731_v47 = vpop.permute.xlu1 %730 }
 0x8c5   :  { %v2403_v61 = vadd.f32 %v731_v47, %v723_v9 }
 0x8c7   :  { %1860 = vtanh.f32 %v2403_v61 }
 0x8c9   :  { %v1859_v48 = vpop.eup %1858 }
 0x8ca   :  { %486 = vrot.lane.b32.xlu0 %v1859_v48, %s2028_s17 }
 0x8cd   :  { %v1861_v50 = vpop.eup %1860 }
 0x8ce   :  { %736 = vrot.lane.b32.xlu1 %v1861_v50, %s2028_s17 }
 0x8f6   :  { %v610_v58 = vpop.permute.xlu2 %609 }
 0x8f7   :  { %v612_v51 = vmul.f32 %v610_v58, %v595_v6 }
 0x8f9   :  { %639 = vrot.lane.b32.xlu1 %v612_v51, %s2029_s18 }
 0x93c   :  { %v487_v54 = vpop.permute.xlu0 %486 }
 0x93d   :  { %v489_v52 = vmul.f32 %v487_v54, %v472_v0 }
 0x93f   :  { %614 = vrot.lane.b32.xlu0 %v489_v52, %s2029_s18 }
 0x940   :  { %v737_v53 = vpop.permute.xlu1 %736 }
 0x941   :  { %v739_v55 = vmul.f32 %v737_v53, %v719_v8 }
 0x943   :  { %v761_v56 = vrot.slane %v739_v55, 6 }
 0x945   :  { %762 = vrot.lane.b32.xlu2 %v761_v56, %s2029_s18 }
 0x96b   :  { %v640_v57 = vpop.permute.xlu1 %639 }
 0x96c   :  { %1755 = vmatmul.msk.f32.vlgmr.msrb.gmra.mxu0 %vm49_vm0, %v640_v57  ;;  %1757 = vmatmul.msk.f32.vlgmr.msra.gmra.mxu2 %vm49_vm0, %v640_v57  ;;  %v916_v57 = vrot.slane %v2403_v61, 6 }
 0x96d   :  { %972 = vmatpush.msrb.mxu0 %v2136_v32  ;;  %1047 = vmatpush.msra.mxu2 %v2224_v25 }
 0x96f   :  { %973 = vmatpush.msrb.mxu0 %v2148_v34  ;;  %1048 = vmatpush.msra.mxu2 %v2229_v26 }
 0x971   :  { %974 = vmatpush.msrb.mxu0 %v2158_v36  ;;  %1049 = vmatpush.msra.mxu2 %v2247_v29 }
 0x973   :  { %975 = vmatpush.msrb.mxu0 %v2171_v38  ;;  %1050 = vmatpush.msra.mxu2 %v2255_v30 }
 0x99f   :  { %v763_v59 = vpop.permute.xlu2 %762 }
 0x9a0   :  { %1761 = vmatmul.msk.f32.vlgmr.msrb.gmra.mxu2 %vm49_vm0, %v763_v59 }
 0x9a1   :  { %1220 = vmatpush.msrb.mxu2 %v2236_v27 }
 0x9a3   :  { %1221 = vmatpush.msrb.mxu2 %v2241_v28 }
 0x9a5   :  { %1222 = vmatpush.msrb.mxu2 %v2270_v42 }
 0x9a7   :  { %1223 = vmatpush.msrb.mxu2 %v2276_v44 }
 0x9b1   :  { %v615_v60 = vpop.permute.xlu0 %614 }
 0x9b2   :  { %1754 = vmatmul.msk.f32.vlgmr.msrb.gmra.mxu3 %vm49_vm0, %v615_v60 }
 0x9b3   :  { %947 = vmatpush.msrb.mxu3 %v2131_v31 }
 0x9b5   :  { %948 = vmatpush.msrb.mxu3 %v2141_v33 }
 0x9b7   :  { %949 = vmatpush.msrb.mxu3 %v2153_v35 }
 0x9b9   :  { %950 = vmatpush.msrb.mxu3 %v2166_v37 }
 0x9ba   :  { %1758 = vmatmul.msk.f32.vlgmr.msra.gmra.mxu3 %vm49_vm0, %v763_v59 }
 0x9bb   :  { %1092 = vmatpush.msra.mxu3 %v2072_v1 }
 0x9bd   :  { %1093 = vmatpush.msra.mxu3 %v2081_v3 }
 0x9bf   :  { %1094 = vmatpush.msra.mxu3 %v2089_v5 }
 0x9c1   :  { %1095 = vmatpush.msra.mxu3 %v2098_v7 }
 0x9e9   :  { %v660_v14 = vpop.f32.mrf.mxu0 }
 0x9ef   :  { %v757_v11 = vpop.f32.mrf.mxu2 }
 0xa23   :  { %v903_v19 = vpop.f32.mrf.mxu2 }
 0xa24   :  { %v906_v62 = vadd.f32 %v903_v19, %v2312_v46 }
 0xa26   :  { %v907_v63 = vadd.f32 %v2110_v10, %v906_v62 }
 0xa28   :  { %v908_v0 = vsub.f32 0.0, %v907_v63 }
 0xa2a   :  { %v909_v2 = vmul.f32 1.442695, %v908_v0 }
 0xa2c   :  { %1862 = vpow2.f32 %v909_v2 }
 0xa2d   :  { %1864 = vtanh.f32 %v907_v63 }
 0xa32   :  { %v1863_v4 = vpop.eup %1862 }
 0xa33   :  { %v911_v6 = vadd.f32 1.0, %v1863_v4  ;;  %v1865_v8 = vpop.eup %1864 }
 0xa35   :  { %1866 = vrcp.f32 %v911_v6  ;;  %v635_v1 = vpop.f32.mrf.mxu3 }
 0xa36   :  { %v661_v3 = vadd.f32 %v660_v14, %v635_v1 }
 0xa38   :  { %v663_v5 = vadd.f32 %v2317_v49, %v661_v3 }
 0xa3a   :  { %v664_v7 = vsub.f32 0.0, %v663_v5 }
 0xa3b   :  { %v1867_v12 = vpop.eup %1866 }
 0xa3c   :  { %v665_v13 = vmul.f32 1.442695, %v664_v7  ;;  %v914_v15 = vsel %vm2116_vm3, %v1865_v8, %v1867_v12 }
 0xa3d   :  { %920 = vrot.lane.b32.xlu2 %v914_v15, %s2028_s17  ;;  %v783_v10 = vpop.f32.mrf.mxu3  ;;  %v918_v59 = vmul.f32 %v916_v57, %v914_v15 }
 0xa3e   :  { %1868 = vpow2.f32 %v665_v13  ;;  %v784_v16 = vadd.f32 %v783_v10, %v757_v11 }
 0xa3f   :  { %1870 = vtanh.f32 %v663_v5 }
 0xa40   :  { %v786_v17 = vadd.f32 %v2195_v43, %v784_v16 }
 0xa42   :  { %v787_v18 = vsub.f32 0.0, %v786_v17 }
 0xa44   :  { %v1869_v20 = vpop.eup %1868  ;;  %v788_v22 = vmul.f32 1.442695, %v787_v18 }
 0xa45   :  { %v667_v24 = vadd.f32 1.0, %v1869_v20  ;;  %v1871_v39 = vpop.eup %1870 }
 0xa46   :  { %1872 = vpow2.f32 %v788_v22 }
 0xa47   :  { %1874 = vrcp.f32 %v667_v24 }
 0xa48   :  { %1876 = vtanh.f32 %v786_v17 }
 0xa4c   :  { %v1873_v40 = vpop.eup %1872 }
 0xa4d   :  { %v1875_v41 = vpop.eup %1874  ;;  %v790_v9 = vadd.f32 1.0, %v1873_v40 }
 0xa4e   :  { %v670_v47 = vsel %vm2116_vm3, %v1871_v39, %v1875_v41  ;;  %v1877_v48 = vpop.eup %1876 }
 0xa4f   :  { %1878 = vrcp.f32 %v790_v9  ;;  %673 = vrot.lane.b32.xlu1 %v670_v47, %s2028_s17  ;;  %v671_v62 = vmul.f32 %v670_v47, %v2400_v45 }
 0xa55   :  { %v1879_v50 = vpop.eup %1878 }
 0xa56   :  { %v793_v58 = vsel %vm2116_vm3, %v1877_v48, %v1879_v50  ;;  %v2521_v48 = vld [vmem:[%s2766_s3] ss:$0 sm:$0xff] }
 0xa57   :  { %796 = vrot.lane.b32.xlu0 %v793_v58, %s2028_s17  ;;  %v794_v2 = vmul.f32 %v793_v58, %v2394_v23 }
 0xa97   :  { %v921_v51 = vpop.permute.xlu2 %920 }
 0xa98   :  { %v923_v54 = vmul.f32 %v921_v51, %v914_v15 }
 0xa9a   :  { %925 = vrot.lane.b32.xlu2 %v923_v54, %s2029_s18 }
 0xac1   :  { %v674_v52 = vpop.permute.xlu1 %673 }
 0xac2   :  { %v676_v53 = vmul.f32 %v674_v52, %v670_v47 }
 0xac4   :  { %678 = vrot.lane.b32.xlu1 %v676_v53, %s2029_s18 }
 0xac9   :  { %v797_v55 = vpop.permute.xlu0 %796 }
 0xaca   :  { %v799_v56 = vmul.f32 %v797_v55, %v793_v58 }
 0xacc   :  { %801 = vrot.lane.b32.xlu0 %v799_v56, %s2029_s18 }
 0xaf4   :  { %v926_v60 = vpop.permute.xlu2 %925 }
 0xaf5   :  { %v2453_v11 = vadd.f32 %v926_v60, %v918_v59 }
 0xaf7   :  { %1880 = vtanh.f32 %v2453_v11 }
 0xafd   :  { %v1881_v19 = vpop.eup %1880 }
 0xafe   :  { %931 = vrot.lane.b32.xlu2 %v1881_v19, %s2028_s17 }
 0xb36   :  { %v679_v63 = vpop.permute.xlu1 %678 }
 0xb37   :  { %v2458_v0 = vadd.f32 %v679_v63, %v671_v62 }
 0xb39   :  { %1882 = vtanh.f32 %v2458_v0 }
 0xb3e   :  { %v802_v4 = vpop.permute.xlu0 %801 }
 0xb3f   :  { %v1883_v61 = vpop.eup %1882  ;;  %v2462_v6 = vadd.f32 %v802_v4, %v794_v2 }
 0xb40   :  { %684 = vrot.lane.b32.xlu1 %v1883_v61, %s2028_s17 }
 0xb41   :  { %1884 = vtanh.f32 %v2462_v6 }
 0xb47   :  { %v1885_v14 = vpop.eup %1884 }
 0xb48   :  { %807 = vrot.lane.b32.xlu0 %v1885_v14, %s2028_s17 }
 0xb58   :  { %v932_v1 = vpop.permute.xlu2 %931 }
 0xb59   :  { %v934_v45 = vmul.f32 %v932_v1, %v914_v15 }
 0xb5b   :  { %956 = vrot.lane.b32.xlu2 %v934_v45, %s2029_s18 }
 0xbb2   :  { %v685_v3 = vpop.permute.xlu1 %684 }
 0xbb3   :  { %v687_v5 = vmul.f32 %v685_v3, %v670_v47 }
 0xbb5   :  { %812 = vrot.lane.b32.xlu1 %v687_v5, %s2029_s18  ;;  %v957_v13 = vpop.permute.xlu2 %956  ;;  %v1113_v5 = vrot.slane %v2453_v11, 6 }
 0xbba   :  { %v808_v23 = vpop.permute.xlu0 %807 }
 0xbbb   :  { %v810_v8 = vmul.f32 %v808_v23, %v793_v58 }
 0xbbd   :  { %837 = vrot.lane.b32.xlu0 %v810_v8, %s2029_s18 }
 0xc27   :  { %v813_v7 = vpop.permute.xlu1 %812 }
 0xc28   :  { %1759 = vmatmul.msk.f32.vlgmr.msra.gmra.mxu0 %vm49_vm0, %v813_v7 }
 0xc29   :  { %1144 = vmatpush.msra.mxu0 %v2131_v31  ;;  %v2482_v31 = vld [vmem:[%s2765_s2 + $0x18] sm:$0xff] }
 0xc2b   :  { %1145 = vmatpush.msra.mxu0 %v2141_v33  ;;  %v2490_v33 = vld [vmem:[%s2765_s2 + $0x10] sm:$0xff] }
 0xc2d   :  { %1146 = vmatpush.msra.mxu0 %v2153_v35 }
 0xc2f   :  { %v838_v12 = vpop.permute.xlu0 %837  ;;  %1147 = vmatpush.msra.mxu0 %v2166_v37 }
 0xc30   :  { %1760 = vmatmul.msk.f32.vlgmr.msrb.gmra.mxu1 %vm49_vm0, %v838_v12  ;;  %1762 = vmatmul.msk.f32.vlgmr.msrb.gmra.mxu3 %vm49_vm0, %v838_v12 }
 0xc31   :  { %1763 = vmatmul.msk.f32.vlgmr.msrb.gmra.mxu0 %vm49_vm0, %v957_v13  ;;  %1170 = vmatpush.msrb.mxu1 %v2136_v32  ;;  %v2498_v32 = vld [vmem:[%s2765_s2 + $0x8] sm:$0xff] }
 0xc32   :  { %1290 = vmatpush.msrb.mxu0 %v2482_v31  ;;  %1245 = vmatpush.msrb.mxu3 %v2224_v25 }
 0xc33   :  { %1171 = vmatpush.msrb.mxu1 %v2148_v34  ;;  %v2507_v34 = vld [vmem:[%s2765_s2] sm:$0xff] }
 0xc34   :  { %1291 = vmatpush.msrb.mxu0 %v2490_v33  ;;  %1246 = vmatpush.msrb.mxu3 %v2229_v26 }
 0xc35   :  { %1172 = vmatpush.msrb.mxu1 %v2158_v36 }
 0xc36   :  { %1292 = vmatpush.msrb.mxu0 %v2498_v32  ;;  %1247 = vmatpush.msrb.mxu3 %v2247_v29 }
 0xc37   :  { %1173 = vmatpush.msrb.mxu1 %v2171_v38 }
 0xc38   :  { %1766 = vmatmul.msk.f32.vlgmr.msra.gmra.mxu3 %vm49_vm0, %v957_v13  ;;  %1293 = vmatpush.msrb.mxu0 %v2507_v34 }
 0xc39   :  { %1248 = vmatpush.msrb.mxu3 %v2255_v30 }
 0xc3b   :  { %1418 = vmatpush.msra.mxu3 %v2236_v27 }
 0xc3d   :  { %1419 = vmatpush.msra.mxu3 %v2241_v28 }
 0xc3f   :  { %1420 = vmatpush.msra.mxu3 %v2270_v42 }
 0xc41   :  { %1421 = vmatpush.msra.mxu3 %v2276_v44 }
 0xca5   :  { %v833_v35 = vpop.f32.mrf.mxu0 }
 0xcad   :  { %v858_v36 = vpop.f32.mrf.mxu1 }
 0xcae   :  { %v859_v37 = vadd.f32 %v858_v36, %v833_v35  ;;  %v977_v10 = vpop.f32.mrf.mxu0 }
 0xcb0   :  { %v861_v38 = vadd.f32 %v2317_v49, %v859_v37 }
 0xcb2   :  { %v862_v15 = vsub.f32 0.0, %v861_v38 }
 0xcb3   :  { %v952_v16 = vpop.f32.mrf.mxu3 }
 0xcb4   :  { %v863_v17 = vmul.f32 1.442695, %v862_v15  ;;  %v978_v18 = vadd.f32 %v977_v10, %v952_v16 }
 0xcb6   :  { %1886 = vpow2.f32 %v863_v17  ;;  %v980_v20 = vadd.f32 %v2195_v43, %v978_v18 }
 0xcb8   :  { %v981_v22 = vsub.f32 0.0, %v980_v20 }
 0xcba   :  { %v982_v24 = vmul.f32 1.442695, %v981_v22 }
 0xcbb   :  { %v1097_v39 = vpop.f32.mrf.mxu3 }
 0xcbc   :  { %v1887_v40 = vpop.eup %1886  ;;  %1888 = vpow2.f32 %v982_v24  ;;  %v1101_v41 = vrot.slane %v1097_v39, 6  ;;  %v2558_v39 = vld [vmem:[%s2765_s2 + $0x38] sm:$0xff] }
 0xcbd   :  { %v865_v9 = vadd.f32 1.0, %v1887_v40  ;;  %1890 = vtanh.f32 %v861_v38  ;;  %v2564_v40 = vld [vmem:[%s2765_s2 + $0x30] sm:$0xff] }
 0xcbe   :  { %v1103_v47 = vadd.f32 %v1101_v41, %v2312_v46 }
 0xcbf   :  { %1892 = vrcp.f32 %v865_v9  ;;  %v2570_v9 = vld [vmem:[%s2765_s2 + $0x28] sm:$0xff] }
 0xcc0   :  { %v1104_v50 = vadd.f32 %v2521_v48, %v1103_v47  ;;  %1894 = vtanh.f32 %v980_v20 }
 0xcc2   :  { %v1889_v58 = vpop.eup %1888  ;;  %v1105_v43 = vsub.f32 0.0, %v1104_v50 }
 0xcc3   :  { %v984_v51 = vadd.f32 1.0, %v1889_v58  ;;  %v1891_v54 = vpop.eup %1890  ;;  %v2584_v58 = vld [vmem:[%s2764_s1 + $0x38] sm:$0xff] }
 0xcc4   :  { %v1106_v52 = vmul.f32 1.442695, %v1105_v43  ;;  %v2593_v43 = vld [vmem:[%s2764_s1 + $0x30] sm:$0xff] }
 0xcc5   :  { %v1893_v53 = vpop.eup %1892  ;;  %1896 = vrcp.f32 %v984_v51  ;;  %v2601_v51 = vld [vmem:[%s2764_s1 + $0x28] sm:$0xff] }
 0xcc6   :  { %1898 = vpow2.f32 %v1106_v52  ;;  %v868_v55 = vsel %vm2116_vm3, %v1891_v54, %v1893_v53  ;;  %v1895_v56 = vpop.eup %1894 }
 0xcc7   :  { %871 = vrot.lane.b32.xlu0 %v868_v55, %s2028_s17  ;;  %1900 = vtanh.f32 %v1104_v50  ;;  %v869_v13 = vmul.f32 %v868_v55, %v2458_v0  ;;  %v2578_v50 = vld [vmem:[%s2765_s2 + $0x20] sm:$0xff]  ;;  %s1713_s2 = sshll.u32 %s2030_s8, 4  ;;  %s1714_s2 = int_to_ptr.vmem [resolvable:$true] %s1713_s2 }
 0xccb   :  { %v1897_v57 = vpop.eup %1896 }
 0xccc   :  { %v1899_v59 = vpop.eup %1898  ;;  %v987_v60 = vsel %vm2116_vm3, %v1895_v56, %v1897_v57 }
 0xccd   :  { %v1108_v19 = vadd.f32 1.0, %v1899_v59  ;;  %990 = vrot.lane.b32.xlu1 %v987_v60, %s2028_s17  ;;  %v1901_v62 = vpop.eup %1900  ;;  %v988_v37 = vmul.f32 %v987_v60, %v2462_v6 }
 0xccf   :  { %1902 = vrcp.f32 %v1108_v19 }
 0xcd5   :  { %v1903_v63 = vpop.eup %1902 }
 0xcd6   :  { %v1111_v2 = vsel %vm2116_vm3, %v1901_v62, %v1903_v63 }
 0xcd7   :  { %1117 = vrot.lane.b32.xlu2 %v1111_v2, %s2028_s17  ;;  %v1115_v23 = vmul.f32 %v1113_v5, %v1111_v2 }
 0xd31   :  { %v1118_v4 = vpop.permute.xlu2 %1117 }
 0xd32   :  { %v1120_v61 = vmul.f32 %v1118_v4, %v1111_v2 }
 0xd34   :  { %1122 = vrot.lane.b32.xlu2 %v1120_v61, %s2029_s18 }
 0xd39   :  { %v872_v14 = vpop.permute.xlu0 %871 }
 0xd3a   :  { %v874_v1 = vmul.f32 %v872_v14, %v868_v55 }
 0xd3c   :  { %876 = vrot.lane.b32.xlu0 %v874_v1, %s2029_s18 }
 0xd3f   :  { %v991_v45 = vpop.permute.xlu1 %990 }
 0xd40   :  { %v993_v3 = vmul.f32 %v991_v45, %v987_v60 }
 0xd42   :  { %995 = vrot.lane.b32.xlu1 %v993_v3, %s2029_s18 }
 0xd8e   :  { %v1123_v8 = vpop.permute.xlu2 %1122 }
 0xd8f   :  { %v2537_v7 = vadd.f32 %v1123_v8, %v1115_v23 }
 0xd91   :  { %1904 = vtanh.f32 %v2537_v7 }
 0xd97   :  { %v1905_v12 = vpop.eup %1904 }
 0xd98   :  { %1128 = vrot.lane.b32.xlu2 %v1905_v12, %s2028_s17 }
 0xdae   :  { %v877_v35 = vpop.permute.xlu0 %876 }
 0xdaf   :  { %v2542_v36 = vadd.f32 %v877_v35, %v869_v13 }
 0xdb1   :  { %1906 = vtanh.f32 %v2542_v36 }
 0xdb4   :  { %v996_v38 = vpop.permute.xlu1 %995 }
 0xdb5   :  { %v2546_v11 = vadd.f32 %v996_v38, %v988_v37 }
 0xdb7   :  { %v1907_v15 = vpop.eup %1906  ;;  %1908 = vtanh.f32 %v2546_v11 }
 0xdb8   :  { %882 = vrot.lane.b32.xlu0 %v1907_v15, %s2028_s17 }
 0xdbd   :  { %v1909_v10 = vpop.eup %1908 }
 0xdbe   :  { %1001 = vrot.lane.b32.xlu1 %v1909_v10, %s2028_s17 }
 0xdf2   :  { %v1129_v16 = vpop.permute.xlu2 %1128 }
 0xdf3   :  { %v1131_v0 = vmul.f32 %v1129_v16, %v1111_v2  ;;  %v1311_v16 = vrot.slane %v2537_v7, 6 }
 0xdf5   :  { %v1153_v17 = vrot.slane %v1131_v0, 2 }
 0xdf7   :  { %1154 = vrot.lane.b32.xlu2 %v1153_v17, %s2029_s18 }
 0xe2a   :  { %v883_v18 = vpop.permute.xlu0 %882 }
 0xe2b   :  { %v885_v20 = vmul.f32 %v883_v18, %v868_v55 }
 0xe2d   :  { %1006 = vrot.lane.b32.xlu0 %v885_v20, %s2029_s18 }
 0xe30   :  { %v1002_v6 = vpop.permute.xlu1 %1001 }
 0xe31   :  { %v1004_v22 = vmul.f32 %v1002_v6, %v987_v60 }
 0xe33   :  { %1031 = vrot.lane.b32.xlu1 %v1004_v22, %s2029_s18 }
 0xe51   :  { %v1155_v47 = vpop.permute.xlu2 %1154 }
 0xe9f   :  { %v1007_v24 = vpop.permute.xlu0 %1006 }
 0xea0   :  { %1764 = vmatmul.msk.f32.vlgmr.msra.gmra.mxu1 %vm49_vm0, %v1007_v24 }
 0xea1   :  { %1342 = vmatpush.msra.mxu1 %v2558_v39 }
 0xea3   :  { %1343 = vmatpush.msra.mxu1 %v2564_v40 }
 0xea5   :  { %v1032_v41 = vpop.permute.xlu1 %1031  ;;  %1344 = vmatpush.msra.mxu1 %v2570_v9 }
 0xea6   :  { %1765 = vmatmul.msk.f32.vlgmr.msra.gmra.mxu2 %vm49_vm0, %v1032_v41  ;;  %1767 = vmatmul.msk.f32.vlgmr.msra.gmra.mxu0 %vm49_vm0, %v1032_v41 }
 0xea7   :  { %1345 = vmatpush.msra.mxu1 %v2578_v50  ;;  %1368 = vmatpush.msra.mxu2 %v2584_v58 }
 0xea8   :  { %1768 = vmatmul.msk.f32.vlgmr.msrb.gmra.mxu1 %vm49_vm0, %v1155_v47  ;;  %1443 = vmatpush.msra.mxu0 %v2224_v25  ;;  %v2609_v25 = vld [vmem:[%s2764_s1 + $0x20] sm:$0xff] }
 0xea9   :  { %1488 = vmatpush.msrb.mxu1 %v2482_v31  ;;  %1369 = vmatpush.msra.mxu2 %v2593_v43 }
 0xeaa   :  { %1444 = vmatpush.msra.mxu0 %v2229_v26 }
 0xeab   :  { %1489 = vmatpush.msrb.mxu1 %v2490_v33  ;;  %1370 = vmatpush.msra.mxu2 %v2601_v51 }
 0xeac   :  { %1445 = vmatpush.msra.mxu0 %v2247_v29 }
 0xead   :  { %1490 = vmatpush.msrb.mxu1 %v2498_v32  ;;  %1371 = vmatpush.msra.mxu2 %v2609_v25  ;;  %v2622_v32 = vld [vmem:[%s2766_s3 + $0x1] ss:$0 sm:$0xff] }
 0xeae   :  { %1771 = vmatmul.msk.f32.vlgmr.msrb.gmra.mxu0 %vm49_vm0, %v1155_v47 }
 0xeaf   :  { %1491 = vmatpush.msrb.mxu1 %v2507_v34  ;;  %1446 = vmatpush.msra.mxu0 %v2255_v30 }
 0xeb1   :  { %1616 = vmatpush.msrb.mxu0 %v2236_v27 }
 0xeb3   :  { %1617 = vmatpush.msrb.mxu0 %v2241_v28 }
 0xeb5   :  { %1618 = vmatpush.msrb.mxu0 %v2270_v42 }
 0xeb7   :  { %1619 = vmatpush.msrb.mxu0 %v2276_v44 }
 0xf1d   :  { %v1027_v26 = vpop.f32.mrf.mxu1 }
 0xf23   :  { %v1149_v29 = vpop.f32.mrf.mxu0 }
 0xf25   :  { %v1175_v31 = vpop.f32.mrf.mxu1 }
 0xf26   :  { %v1176_v33 = vadd.f32 %v1175_v31, %v1149_v29 }
 0xf28   :  { %v1178_v34 = vadd.f32 %v2622_v32, %v1176_v33 }
 0xf29   :  { %v1052_v30 = vpop.f32.mrf.mxu2 }
 0xf2a   :  { %v1179_v54 = vsub.f32 0.0, %v1178_v34  ;;  %v1053_v27 = vadd.f32 %v1052_v30, %v1027_v26 }
 0xf2b   :  { %v1295_v52 = vpop.f32.mrf.mxu0 }
 0xf2c   :  { %v1180_v28 = vmul.f32 1.442695, %v1179_v54  ;;  %v1055_v42 = vadd.f32 %v2317_v49, %v1053_v27  ;;  %v1299_v53 = vrot.slane %v1295_v52, 4  ;;  %v1996_v52 = vld [vmem:[%s2764_s1 + $0x58] sm:$0xff] }
 0xf2e   :  { %1910 = vpow2.f32 %v1180_v28  ;;  %v1056_v44 = vsub.f32 0.0, %v1055_v42  ;;  %v1301_v55 = vadd.f32 %v1299_v53, %v2312_v46 }
 0xf30   :  { %v1057_v56 = vmul.f32 1.442695, %v1056_v44  ;;  %v1302_v57 = vadd.f32 %v2521_v48, %v1301_v55 }
 0xf32   :  { %1912 = vpow2.f32 %v1057_v56  ;;  %v1303_v59 = vsub.f32 0.0, %v1302_v57 }
 0xf33   :  { %1914 = vtanh.f32 %v1178_v34 }
 0xf34   :  { %v1911_v60 = vpop.eup %1910  ;;  %v1304_v19 = vmul.f32 1.442695, %v1303_v59 }
 0xf35   :  { %v1182_v62 = vadd.f32 1.0, %v1911_v60 }
 0xf36   :  { %1916 = vpow2.f32 %v1304_v19 }
 0xf37   :  { %1918 = vrcp.f32 %v1182_v62 }
 0xf38   :  { %v1913_v63 = vpop.eup %1912  ;;  %1920 = vtanh.f32 %v1055_v42  ;;  %v1997_v42 = vld [vmem:[%s2764_s1 + $0x50] sm:$0xff] }
 0xf39   :  { %v1059_v2 = vadd.f32 1.0, %v1913_v63  ;;  %v1915_v49 = vpop.eup %1914 }
 0xf3b   :  { %1922 = vrcp.f32 %v1059_v2 }
 0xf3c   :  { %v1917_v4 = vpop.eup %1916  ;;  %1924 = vtanh.f32 %v1302_v57 }
 0xf3d   :  { %v1919_v61 = vpop.eup %1918  ;;  %v1306_v14 = vadd.f32 1.0, %v1917_v4 }
 0xf3e   :  { %v1185_v1 = vsel %vm2116_vm3, %v1915_v49, %v1919_v61  ;;  %v1921_v45 = vpop.eup %1920 }
 0xf3f   :  { %1926 = vrcp.f32 %v1306_v14  ;;  %1188 = vrot.lane.b32.xlu1 %v1185_v1, %s2028_s17  ;;  %v1186_v6 = vmul.f32 %v1185_v1, %v2546_v11 }
 0xf41   :  { %v1923_v3 = vpop.eup %1922 }
 0xf42   :  { %v1062_v5 = vsel %vm2116_vm3, %v1921_v45, %v1923_v3  ;;  %v1925_v23 = vpop.eup %1924 }
 0xf43   :  { %1065 = vrot.lane.b32.xlu0 %v1062_v5, %s2028_s17  ;;  %v1063_v41 = vmul.f32 %v1062_v5, %v2542_v36 }
 0xf45   :  { %v1927_v8 = vpop.eup %1926 }
 0xf46   :  { %v1309_v12 = vsel %vm2116_vm3, %v1925_v23, %v1927_v8 }
 0xf47   :  { %1315 = vrot.lane.b32.xlu2 %v1309_v12, %s2028_s17  ;;  %v1313_v0 = vmul.f32 %v1311_v16, %v1309_v12 }
 0xfa1   :  { %v1316_v13 = vpop.permute.xlu2 %1315 }
 0xfa2   :  { %v1318_v35 = vmul.f32 %v1316_v13, %v1309_v12 }
 0xfa4   :  { %1320 = vrot.lane.b32.xlu2 %v1318_v35, %s2029_s18 }
 0xfb1   :  { %v1189_v37 = vpop.permute.xlu1 %1188 }
 0xfb2   :  { %v1191_v38 = vmul.f32 %v1189_v37, %v1185_v1 }
 0xfb4   :  { %1193 = vrot.lane.b32.xlu1 %v1191_v38, %s2029_s18 }
 0xfb5   :  { %v1066_v15 = vpop.permute.xlu0 %1065 }
 0xfb6   :  { %v1068_v10 = vmul.f32 %v1066_v15, %v1062_v5 }
 0xfb8   :  { %1070 = vrot.lane.b32.xlu0 %v1068_v10, %s2029_s18 }
 0xffe   :  { %v1321_v17 = vpop.permute.xlu2 %1320 }
 0xfff   :  { %v2641_v18 = vadd.f32 %v1321_v17, %v1313_v0 }
0x1001   :  { %1928 = vtanh.f32 %v2641_v18 }
0x1007   :  { %v1929_v20 = vpop.eup %1928 }
0x1008   :  { %1326 = vrot.lane.b32.xlu2 %v1929_v20, %s2028_s17 }
0x1026   :  { %v1194_v22 = vpop.permute.xlu1 %1193 }
0x1027   :  { %v2646_v24 = vadd.f32 %v1194_v22, %v1186_v6 }
0x1029   :  { %1930 = vtanh.f32 %v2646_v24 }
0x102a   :  { %v1071_v47 = vpop.permute.xlu0 %1070 }
0x102b   :  { %v2650_v7 = vadd.f32 %v1071_v47, %v1063_v41 }
0x102d   :  { %1932 = vtanh.f32 %v2650_v7 }
0x102f   :  { %v1931_v26 = vpop.eup %1930 }
0x1030   :  { %1199 = vrot.lane.b32.xlu1 %v1931_v26, %s2028_s17 }
0x1033   :  { %v1933_v29 = vpop.eup %1932 }
0x1034   :  { %1076 = vrot.lane.b32.xlu0 %v1933_v29, %s2028_s17  ;;  %v1509_v29 = vrot.slane %v2641_v18, 6 }
0x1062   :  { %v1327_v31 = vpop.permute.xlu2 %1326 }
0x1063   :  { %v1329_v11 = vmul.f32 %v1327_v31, %v1309_v12 }
0x1065   :  { %v1351_v33 = vrot.slane %v1329_v11, 4 }
0x1067   :  { %1352 = vrot.lane.b32.xlu2 %v1351_v33, %s2029_s18 }
0x10a2   :  { %v1200_v34 = vpop.permute.xlu1 %1199 }
0x10a3   :  { %v1202_v30 = vmul.f32 %v1200_v34, %v1185_v1 }
0x10a5   :  { %1229 = vrot.lane.b32.xlu1 %v1202_v30, %s2029_s18 }
0x10a6   :  { %v1077_v36 = vpop.permute.xlu0 %1076 }
0x10a7   :  { %v1079_v54 = vmul.f32 %v1077_v36, %v1062_v5 }
0x10a9   :  { %1204 = vrot.lane.b32.xlu0 %v1079_v54, %s2029_s18 }
0x10c1   :  { %v1353_v53 = vpop.permute.xlu2 %1352 }
0x1117   :  { %v1230_v27 = vpop.permute.xlu1 %1229 }
0x1118   :  { %1770 = vmatmul.msk.f32.vlgmr.msrb.gmra.mxu3 %vm49_vm0, %v1230_v27  ;;  %1772 = vmatmul.msk.f32.vlgmr.msra.gmra.mxu1 %vm49_vm0, %v1230_v27 }
0x1119   :  { %1566 = vmatpush.msrb.mxu3 %v2584_v58  ;;  %1641 = vmatpush.msra.mxu1 %v1996_v52  ;;  %v1998_v58 = vld [vmem:[%s2764_s1 + $0x48] sm:$0xff] }
0x111b   :  { %v1205_v28 = vpop.permute.xlu0 %1204  ;;  %1567 = vmatpush.msrb.mxu3 %v2593_v43  ;;  %1642 = vmatpush.msra.mxu1 %v1997_v42 }
0x111c   :  { %1769 = vmatmul.msk.f32.vlgmr.msrb.gmra.mxu2 %vm49_vm0, %v1205_v28 }
0x111d   :  { %1540 = vmatpush.msrb.mxu2 %v2558_v39  ;;  %1568 = vmatpush.msrb.mxu3 %v2601_v51  ;;  %v1999_v39 = vld [vmem:[%s2764_s1 + $0x40] sm:$0xff] }
0x111e   :  { %1643 = vmatpush.msra.mxu1 %v1998_v58 }
0x111f   :  { %1541 = vmatpush.msrb.mxu2 %v2564_v40  ;;  %1569 = vmatpush.msrb.mxu3 %v2609_v25 }
0x1120   :  { %1776 = vmatmul.msk.f32.vlgmr.msrb.gmra.mxu1 %vm49_vm0, %v1353_v53 }
0x1121   :  { %1542 = vmatpush.msrb.mxu2 %v2570_v9  ;;  %1644 = vmatpush.msra.mxu1 %v1999_v39  ;;  %v2688_v9 = vld [vmem:[%s2766_s3 + $0x2] ss:$0 sm:$0xff] }
0x1123   :  { %1543 = vmatpush.msrb.mxu2 %v2578_v50 }
0x1124   :  { %1773 = vmatmul.msk.f32.vlgmr.msra.gmra.mxu2 %vm49_vm0, %v1353_v53 }
0x1195   :  { %v1347_v43 = vpop.f32.mrf.mxu1 }
0x119b   :  { %v1250_v55 = vpop.f32.mrf.mxu3 }
0x119d   :  { %v1493_v51 = vpop.f32.mrf.mxu1 }
0x119e   :  { %v1497_v44 = vrot.slane %v1493_v51, 2 }
0x119f   :  { %v1225_v40 = vpop.f32.mrf.mxu2 }
0x11a0   :  { %v1499_v25 = vadd.f32 %v1497_v44, %v2312_v46  ;;  %v1251_v56 = vadd.f32 %v1250_v55, %v1225_v40 }
0x11a2   :  { %v1500_v57 = vadd.f32 %v2521_v48, %v1499_v25  ;;  %v1253_v59 = vadd.f32 %v2688_v9, %v1251_v56 }
0x11a4   :  { %v1501_v50 = vsub.f32 0.0, %v1500_v57  ;;  %v1254_v60 = vsub.f32 0.0, %v1253_v59 }
0x11a6   :  { %v1502_v19 = vmul.f32 1.442695, %v1501_v50  ;;  %v1255_v62 = vmul.f32 1.442695, %v1254_v60 }
0x11a7   :  { %v1373_v63 = vpop.f32.mrf.mxu2 }
0x11a8   :  { %1934 = vpow2.f32 %v1502_v19  ;;  %v1374_v2 = vadd.f32 %v1373_v63, %v1347_v43 }
0x11a9   :  { %1936 = vpow2.f32 %v1255_v62 }
0x11aa   :  { %v1376_v46 = vadd.f32 %v2622_v32, %v1374_v2  ;;  %1938 = vtanh.f32 %v1500_v57 }
0x11ab   :  { %1940 = vtanh.f32 %v1253_v59 }
0x11ac   :  { %v1377_v49 = vsub.f32 0.0, %v1376_v46 }
0x11ae   :  { %v1935_v4 = vpop.eup %1934  ;;  %v1378_v48 = vmul.f32 1.442695, %v1377_v49 }
0x11af   :  { %v1937_v61 = vpop.eup %1936  ;;  %v1504_v14 = vadd.f32 1.0, %v1935_v4 }
0x11b0   :  { %v1257_v1 = vadd.f32 1.0, %v1937_v61  ;;  %1942 = vpow2.f32 %v1378_v48  ;;  %v1939_v45 = vpop.eup %1938 }
0x11b1   :  { %1944 = vrcp.f32 %v1504_v14  ;;  %v1941_v3 = vpop.eup %1940 }
0x11b2   :  { %1946 = vrcp.f32 %v1257_v1 }
0x11b3   :  { %1948 = vtanh.f32 %v1376_v46 }
0x11b6   :  { %v1943_v5 = vpop.eup %1942 }
0x11b7   :  { %v1945_v23 = vpop.eup %1944  ;;  %v1380_v8 = vadd.f32 1.0, %v1943_v5 }
0x11b8   :  { %v1947_v12 = vpop.eup %1946  ;;  %v1507_v13 = vsel %vm2116_vm3, %v1939_v45, %v1945_v23 }
0x11b9   :  { %1950 = vrcp.f32 %v1380_v8  ;;  %1513 = vrot.lane.b32.xlu1 %v1507_v13, %s2028_s17  ;;  %v1260_v35 = vsel %vm2116_vm3, %v1941_v3, %v1947_v12  ;;  %v1949_v37 = vpop.eup %1948  ;;  %v1511_v31 = vmul.f32 %v1509_v29, %v1507_v13 }
0x11ba   :  { %1263 = vrot.lane.b32.xlu0 %v1260_v35, %s2028_s17  ;;  %v1261_v33 = vmul.f32 %v1260_v35, %v2650_v7 }
0x11bf   :  { %v1951_v38 = vpop.eup %1950 }
0x11c0   :  { %v1383_v15 = vsel %vm2116_vm3, %v1949_v37, %v1951_v38 }
0x11c1   :  { %1386 = vrot.lane.b32.xlu2 %v1383_v15, %s2028_s17  ;;  %v1384_v22 = vmul.f32 %v1383_v15, %v2646_v24 }
0x121b   :  { %v1387_v10 = vpop.permute.xlu2 %1386 }
0x121c   :  { %v1389_v16 = vmul.f32 %v1387_v10, %v1383_v15 }
0x121e   :  { %1391 = vrot.lane.b32.xlu2 %v1389_v16, %s2029_s18 }
0x122b   :  { %v1514_v0 = vpop.permute.xlu1 %1513 }
0x122c   :  { %v1516_v17 = vmul.f32 %v1514_v0, %v1507_v13  ;;  %v1264_v20 = vpop.permute.xlu0 %1263 }
0x122d   :  { %v1266_v6 = vmul.f32 %v1264_v20, %v1260_v35 }
0x122e   :  { %1518 = vrot.lane.b32.xlu1 %v1516_v17, %s2029_s18 }
0x122f   :  { %1268 = vrot.lane.b32.xlu0 %v1266_v6, %s2029_s18 }
0x1278   :  { %v1392_v41 = vpop.permute.xlu2 %1391 }
0x1279   :  { %v2705_v47 = vadd.f32 %v1392_v41, %v1384_v22 }
0x127b   :  { %1952 = vtanh.f32 %v2705_v47 }
0x1281   :  { %v1953_v26 = vpop.eup %1952 }
0x1282   :  { %1397 = vrot.lane.b32.xlu2 %v1953_v26, %s2028_s17 }
0x12a0   :  { %v1519_v11 = vpop.permute.xlu1 %1518 }
0x12a1   :  { %v1521_v34 = vadd.f32 %v1519_v11, %v1511_v31  ;;  %v1269_v30 = vpop.permute.xlu0 %1268 }
0x12a2   :  { %v1271_v36 = vadd.f32 %v1269_v30, %v1261_v33 }
0x12a3   :  { %1954 = vtanh.f32 %v1521_v34 }
0x12a4   :  { %1956 = vtanh.f32 %v1271_v36 }
0x12a9   :  { %v1955_v24 = vpop.eup %1954 }
0x12aa   :  { %v1957_v54 = vpop.eup %1956  ;;  %1524 = vrot.lane.b32.xlu1 %v1955_v24, %s2028_s17 }
0x12ab   :  { %1274 = vrot.lane.b32.xlu0 %v1957_v54, %s2028_s17 }
0x12dc   :  { %v1398_v27 = vpop.permute.xlu2 %1397 }
0x12dd   :  { %v1400_v52 = vmul.f32 %v1398_v27, %v1383_v15 }
0x12df   :  { %1427 = vrot.lane.b32.xlu1 %v1400_v52, %s2029_s18 }
0x131c   :  { %v1525_v18 = vpop.permute.xlu1 %1524 }
0x131d   :  { %v1527_v28 = vmul.f32 %v1525_v18, %v1507_v13  ;;  %v1275_v42 = vpop.permute.xlu0 %1274 }
0x131e   :  { %v1277_v58 = vmul.f32 %v1275_v42, %v1260_v35  ;;  %v1677_v42 = vld [vmem:[%s2767_s4 + $0x18] sm:$0xff] }
0x131f   :  { %v1549_v7 = vrot.slane %v1527_v28, 6  ;;  %1699 = vmatpush.msra.mxu2 %v1677_v42 }
0x1320   :  { %1402 = vrot.lane.b32.xlu0 %v1277_v58, %s2029_s18  ;;  %v1675_v58 = vld [vmem:[%s2767_s4 + $0x8] sm:$0xff] }
0x1321   :  { %1550 = vrot.lane.b32.xlu2 %v1549_v7, %s2029_s18  ;;  %1700 = vmatpush.msra.mxu2 %v1676_v21  ;;  %v1674_v7 = vld [vmem:[%s2767_s4] sm:$0xff] }
0x1323   :  { %1701 = vmatpush.msra.mxu2 %v1675_v58 }
0x1325   :  { %1702 = vmatpush.msra.mxu2 %v1674_v7 }
0x1351   :  { %v1428_v53 = vpop.permute.xlu1 %1427 }
0x1352   :  { %1775 = vmatmul.msk.f32.vlgmr.msra.gmra.mxu0 %vm49_vm0, %v1428_v53  ;;  %1777 = vmatmul.msk.f32.vlgmr.msrb.gmra.mxu2 %vm49_vm0, %v1428_v53 }
0x137b   :  { %v1551_v43 = vpop.permute.xlu2 %1550 }
0x1392   :  { %v1403_v39 = vpop.permute.xlu0 %1402 }
0x1393   :  { %1774 = vmatmul.msk.f32.vlgmr.msra.gmra.mxu3 %vm49_vm0, %v1403_v39 }
0x139b   :  { %1778 = vmatmul.msk.f32.vlgmr.msrb.gmra.mxu3 %vm49_vm0, %v1551_v43 }
0x13cf   :  { %v1448_v51 = vpop.f32.mrf.mxu0 }
0x13d5   :  { %v1545_v57 = vpop.f32.mrf.mxu2 }
0x1416   :  { %v1423_v44 = vpop.f32.mrf.mxu3 }
0x1417   :  { %v1449_v55 = vadd.f32 %v1448_v51, %v1423_v44  ;;  %v1789_v51 = vld [vmem:[%s2768_s5] ss:$0 sm:$0xff] }
0x1419   :  { %v1451_v40 = vadd.f32 %v2688_v9, %v1449_v55 }
0x141b   :  { %v1452_v25 = vsub.f32 0.0, %v1451_v40 }
0x141d   :  { %v1453_v56 = vmul.f32 1.442695, %v1452_v25 }
0x141e   :  { %v1571_v59 = vpop.f32.mrf.mxu3 }
0x141f   :  { %1958 = vpow2.f32 %v1453_v56  ;;  %v1572_v50 = vadd.f32 %v1571_v59, %v1545_v57 }
0x1420   :  { %1960 = vtanh.f32 %v1451_v40 }
0x1421   :  { %v1574_v60 = vadd.f32 %v2622_v32, %v1572_v50 }
0x1423   :  { %v1575_v19 = vsub.f32 0.0, %v1574_v60 }
0x1425   :  { %v1959_v62 = vpop.eup %1958  ;;  %v1576_v63 = vmul.f32 1.442695, %v1575_v19 }
0x1426   :  { %v1455_v2 = vadd.f32 1.0, %v1959_v62  ;;  %v1961_v46 = vpop.eup %1960 }
0x1427   :  { %1962 = vpow2.f32 %v1576_v63 }
0x1428   :  { %1964 = vrcp.f32 %v1455_v2 }
0x1429   :  { %1966 = vtanh.f32 %v1574_v60 }
0x142d   :  { %v1963_v49 = vpop.eup %1962 }
0x142e   :  { %v1965_v4 = vpop.eup %1964  ;;  %v1578_v48 = vadd.f32 1.0, %v1963_v49 }
0x142f   :  { %v1458_v61 = vsel %vm2116_vm3, %v1961_v46, %v1965_v4  ;;  %v1967_v14 = vpop.eup %1966 }
0x1430   :  { %1968 = vrcp.f32 %v1578_v48  ;;  %1461 = vrot.lane.b32.xlu0 %v1458_v61, %s2028_s17  ;;  %v1459_v8 = vmul.f32 %v1458_v61, %v1271_v36 }
0x1436   :  { %v1969_v32 = vpop.eup %1968 }
0x1437   :  { %v1581_v1 = vsel %vm2116_vm3, %v1967_v14, %v1969_v32 }
0x1438   :  { %1584 = vrot.lane.b32.xlu1 %v1581_v1, %s2028_s17  ;;  %v1582_v37 = vmul.f32 %v1581_v1, %v2705_v47 }
0x14a2   :  { %v1462_v45 = vpop.permute.xlu0 %1461 }
0x14a3   :  { %v1464_v3 = vmul.f32 %v1462_v45, %v1458_v61 }
0x14a5   :  { %1466 = vrot.lane.b32.xlu2 %v1464_v3, %s2029_s18 }
0x14aa   :  { %v1585_v5 = vpop.permute.xlu1 %1584 }
0x14ab   :  { %v1587_v23 = vmul.f32 %v1585_v5, %v1581_v1 }
0x14ad   :  { %1589 = vrot.lane.b32.xlu0 %v1587_v23, %s2029_s18 }
0x14ff   :  { %v1467_v12 = vpop.permute.xlu2 %1466 }
0x1500   :  { %v1469_v13 = vadd.f32 %v1467_v12, %v1459_v8 }
0x1502   :  { %1970 = vtanh.f32 %v1469_v13 }
0x1508   :  { %v1971_v35 = vpop.eup %1970 }
0x1509   :  { %1472 = vrot.lane.b32.xlu1 %v1971_v35, %s2028_s17 }
0x151f   :  { %v1590_v38 = vpop.permute.xlu0 %1589 }
0x1520   :  { %v1592_v15 = vadd.f32 %v1590_v38, %v1582_v37 }
0x1522   :  { %1972 = vtanh.f32 %v1592_v15 }
0x1528   :  { %v1973_v10 = vpop.eup %1972 }
0x1529   :  { %1595 = vrot.lane.b32.xlu2 %v1973_v10, %s2028_s17 }
0x157b   :  { %v1473_v16 = vpop.permute.xlu1 %1472 }
0x157c   :  { %v1475_v0 = vmul.f32 %v1473_v16, %v1458_v61 }
0x157e   :  { %1600 = vrot.lane.b32.xlu0 %v1475_v0, %s2029_s18 }
0x1583   :  { %v1596_v17 = vpop.permute.xlu2 %1595 }
0x1584   :  { %v1598_v20 = vmul.f32 %v1596_v17, %v1581_v1 }
0x1586   :  { %1625 = vrot.lane.b32.xlu1 %v1598_v20, %s2029_s18 }
0x15f0   :  { %v1601_v6 = vpop.permute.xlu0 %1600 }
0x15f1   :  { %1779 = vmatmul.msk.f32.vlgmr.msrb.gmra.mxu0 %vm49_vm0, %v1601_v6 }
0x15f8   :  { %v1626_v22 = vpop.permute.xlu1 %1625 }
0x15f9   :  { %1780 = vmatmul.msk.f32.vlgmr.msra.gmra.mxu1 %vm49_vm0, %v1626_v22 }
0x166e   :  { %v1621_v41 = vpop.f32.mrf.mxu0 }
0x1676   :  { %v1646_v47 = vpop.f32.mrf.mxu1 }
0x1677   :  { %v1647_v26 = vadd.f32 %v1646_v47, %v1621_v41 }
0x1679   :  { %v1649_v29 = vadd.f32 %v2688_v9, %v1647_v26 }
0x167b   :  { %v1650_v31 = vsub.f32 0.0, %v1649_v29 }
0x167d   :  { %v1651_v11 = vmul.f32 1.442695, %v1650_v31 }
0x167f   :  { %1974 = vpow2.f32 %v1651_v11 }
0x1680   :  { %1976 = vtanh.f32 %v1649_v29 }
0x1685   :  { %v1975_v33 = vpop.eup %1974 }
0x1686   :  { %v1653_v34 = vadd.f32 1.0, %v1975_v33  ;;  %v1977_v30 = vpop.eup %1976 }
0x1688   :  { %1978 = vrcp.f32 %v1653_v34 }
0x168e   :  { %v1979_v36 = vpop.eup %1978 }
0x168f   :  { %v1656_v24 = vsel %vm2116_vm3, %v1977_v30, %v1979_v36 }
0x1690   :  { %1659 = vrot.lane.b32.xlu2 %v1656_v24, %s2028_s17  ;;  %v1657_v52 = vmul.f32 %v1656_v24, %v1469_v13 }
0x16ea   :  { %v1660_v54 = vpop.permute.xlu2 %1659 }
0x16eb   :  { %v1662_v27 = vmul.f32 %v1660_v54, %v1656_v24 }
0x16ed   :  { %1664 = vrot.lane.b32.xlu0 %v1662_v27, %s2029_s18 }
0x175f   :  { %v1665_v9 = vpop.permute.xlu0 %1664 }
0x1760   :  { %v1667_v18 = vadd.f32 %v1665_v9, %v1657_v52 }
0x1762   :  { %1980 = vtanh.f32 %v1667_v18 }
0x1768   :  { %v1981_v28 = vpop.eup %1980 }
0x1769   :  { %1670 = vrot.lane.b32.xlu1 %v1981_v28, %s2028_s17 }
0x17db   :  { %v1671_v53 = vpop.permute.xlu1 %1670 }
0x17dc   :  { %v1673_v39 = vmul.f32 %v1671_v53, %v1656_v24 }
0x17de   :  { %1683 = vrot.lane.b32.xlu2 %v1673_v39, %s2029_s18 }
0x1838   :  { %v1684_v43 = vpop.permute.xlu2 %1683 }
0x1839   :  { %1781 = vmatmul.msk.f32.vlgmr.msra.gmra.mxu2 %vm49_vm0, %v1684_v43 }
0x18bc   :  { %v1704_v44 = vpop.f32.mrf.mxu2 }
0x18bd   :  { %v1705_v55 = vadd.f32 %v1789_v51, %v1704_v44 }
0x18bf   :  { %1707 = vst [vmem:[#allocation2] sm:$0x3] %v1705_v55 }
0x18c0   :  { %1718 = dma.vmem_to_hbm [thread:$0]  %s1714_s2, 32, %s1716_s11, [#allocation3]  }
0x18c1   :  { %2025 = dma.done.wait [#allocation3], 32  }
0x18c2   :  { %2026 = vsyncadd [#allocation3], 4294967264 }
0x18c3   :  { %1723 = vsyncpa [#allocation3], 1 }

</bundles_post_ra>
